<compile_context>
chip_gen: v7x
topology: tpu7x:2x2x1
jax: 0.10.0
libtpu: 0.0.40
codegen_flags: <defaults>
</compile_context>

<pallas_src>
import functools

import jax
import jax.numpy as jnp
from jax.experimental import pallas as pl
from jax.experimental.pallas import tpu as pltpu

NEG_SLOPE = 0.01   # nn.LeakyReLU() default
LANE = 128


def _leaky_relu(x):
    return jnp.where(x >= 0, x, NEG_SLOPE * x)


def _round_up(x, m):
    return (x + m - 1) // m * m


def _cdiv(a, b):
    return -(-a // b)


def _pad2(a, rows, cols):
    return jnp.pad(a, ((0, rows - a.shape[0]), (0, cols - a.shape[1])))


def _num_tensorcores():
    """TensorCores visible to one pallas_call on the default device (best effort)."""
    try:
        kind = str(jax.devices()[0].device_kind).lower()
        if "v4" in kind or "v5p" in kind or "7" in kind:   # megacore / dual-TC chips
            return 2
    except Exception:
        pass
    return 1                                               # v5e / v6e: single TC


def _default_act_dtype():
    """bf16 LeakyReLU on chips with a bf16 VALU (v6e/v7x); f32 elsewhere (v5e)."""
    try:
        kind = str(jax.devices()[0].device_kind).lower()
        if "v6" in kind or "7" in kind:
            return jnp.bfloat16
    except Exception:
        pass
    return jnp.float32


def _choose_batch_tiling(batch, n_tc, max_tile_m):
    """(tile_m, grid_m, padded_batch): one big tile per TensorCore when it fits."""
    b8 = _round_up(max(batch, 1), 8)
    grid_m = max(n_tc, _cdiv(b8, max_tile_m))
    grid_m = _round_up(grid_m, n_tc)          # keep grid a multiple of #TCs
    tile_m = _round_up(_cdiv(b8, grid_m), 8)  # f32 sublane granularity
    return tile_m, grid_m, tile_m * grid_m


def _birxn_mlp_kernel(idx_ref,          # scalar prefetch (SMEM): reaction index
                      state_ref,        # (TM, n_in)      f32  (natural width)
                      rxn_ref,          # (1, 1, n_hid_p) f32  (pre-gathered row)
                      ws_ref, bs_ref,   # lin_state: (n_in, n_hid_p) bf16, (1, n_hid_p) f32
                      w0_ref, b0_ref,   # mlp layer 0: (n_hid_p, n_hid_p) bf16, (1, n_hid_p) f32
                      w1_ref, b1_ref,   # mlp layer 1
                      w2_ref, b2_ref,   # mlp layer 2: (n_hid_p, n_out) bf16, (1, n_out) f32
                      out_ref,          # (TM, n_out) f32 (unpadded writeback)
                      *, act_dtype, compute_dtype):
    del idx_ref  # row selection already happened in the rxn BlockSpec index_map

    # Fold (state bias + reaction embedding row) once per tile: a single
    # (1, n_hid_p) add instead of two (TM, n_hid_p) broadcast adds.
    bias0 = bs_ref[...] + rxn_ref[...][0]                    # (1, n_hid_p) f32

    x = state_ref[...].astype(compute_dtype)                 # in-kernel bf16 cast
    h = jnp.dot(x, ws_ref[...], preferred_element_type=jnp.float32) + bias0
    h = _leaky_relu(h.astype(act_dtype)).astype(compute_dtype)

    h = jnp.dot(h, w0_ref[...], preferred_element_type=jnp.float32) + b0_ref[...]
    h = _leaky_relu(h.astype(act_dtype)).astype(compute_dtype)

    h = jnp.dot(h, w1_ref[...], preferred_element_type=jnp.float32) + b1_ref[...]
    h = _leaky_relu(h.astype(act_dtype)).astype(compute_dtype)

    out = jnp.dot(h, w2_ref[...], preferred_element_type=jnp.float32) + b2_ref[...]
    out_ref[...] = out.astype(out_ref.dtype)


def prepare_params(params, compute_dtype=jnp.bfloat16):
    """One-time padding + dtype casts (hoisted out of the per-call forward).

    Zero padding is semantically inert: padded weight rows/cols and bias lanes
    contribute exact zeros through bias add + LeakyReLU + the following matmuls.
    """
    n_in, n_hid = params["ws"].shape
    n_out = params["w2"].shape[1]
    n_rxn = params["rxn_table"].shape[0]
    n_hid_p = _round_up(n_hid, LANE)   # hidden dim lane-padded once, at init

    rxn = _pad2(params["rxn_table"], n_rxn, n_hid_p).astype(jnp.float32)
    return {
        "ws": _pad2(params["ws"], n_in, n_hid_p).astype(compute_dtype),
        "bs": _pad2(params["bs"], 1, n_hid_p).astype(jnp.float32),
        "w0": _pad2(params["w0"], n_hid_p, n_hid_p).astype(compute_dtype),
        "b0": _pad2(params["b0"], 1, n_hid_p).astype(jnp.float32),
        "w1": _pad2(params["w1"], n_hid_p, n_hid_p).astype(compute_dtype),
        "b1": _pad2(params["b1"], 1, n_hid_p).astype(jnp.float32),
        "w2": _pad2(params["w2"], n_hid_p, n_out).astype(compute_dtype),
        "b2": params["b2"].astype(jnp.float32),                    # (1, n_out), unpadded
        # (n_rxn, 1, n_hid_p): a single row is then a legal (1, 1, n_hid_p) block.
        "rxn": rxn.reshape(n_rxn, 1, n_hid_p),
        "dims": (int(n_in), int(n_hid), int(n_out), int(n_rxn), int(n_hid_p)),
        "compute_dtype": compute_dtype,
    }


def birxn_mlp_forward(state, bi_rxn_idx, prep, *, max_tile_m=1024, act_dtype=None):
    """state: (B, n_in) f32; bi_rxn_idx: int; prep: output of prepare_params()."""
    n_in, _, n_out, n_rxn, n_hid_p = prep["dims"]
    compute_dtype = prep["compute_dtype"]
    if act_dtype is None:
        act_dtype = _default_act_dtype()

    B = state.shape[0]
    assert state.shape[1] == n_in

    n_tc = _num_tensorcores()
    tm, grid_m, B_p = _choose_batch_tiling(B, n_tc, max_tile_m)
    if B_p != B:   # only pads rows when B doesn't divide the chosen tiling
        state = jnp.pad(state, ((0, B_p - B), (0, 0)))

    # Clamp the reaction index: the index_map DMA has no friendly OOB behavior.
    idx = jnp.clip(jnp.asarray(bi_rxn_idx, jnp.int32), 0, n_rxn - 1).reshape((1,))

    # Constant index maps -> blocks never change across the batch grid: Pallas keeps
    # the weights/biases VMEM-resident and DMAs them only once.
    def const_spec(shape):
        return pl.BlockSpec(shape, lambda i, idx_ref: (0,) * len(shape))

    grid_spec = pltpu.PrefetchScalarGridSpec(
        num_scalar_prefetch=1,
        grid=(grid_m,),
        in_specs=[
            # state tile: natural feature width (full-dim lane exception), f32 in HBM
            pl.BlockSpec((tm, n_in), lambda i, idx_ref: (i, 0)),
            # only the selected reaction row, gathered via the prefetched index
            pl.BlockSpec((1, 1, n_hid_p), lambda i, idx_ref: (idx_ref[0], 0, 0)),
            const_spec((n_in, n_hid_p)), const_spec((1, n_hid_p)),      # lin_state
            const_spec((n_hid_p, n_hid_p)), const_spec((1, n_hid_p)),   # mlp layer 0
            const_spec((n_hid_p, n_hid_p)), const_spec((1, n_hid_p)),   # mlp layer 1
            const_spec((n_hid_p, n_out)), const_spec((1, n_out)),       # mlp layer 2
        ],
        out_specs=pl.BlockSpec((tm, n_out), lambda i, idx_ref: (i, 0)),
    )

    flops = 2 * B_p * (n_in * n_hid_p + 2 * n_hid_p * n_hid_p + n_hid_p * n_out)
    bytes_accessed = (
        B_p * n_in * 4 + B_p * n_out * 4                                    # state + out
        + 2 * (n_in * n_hid_p + 2 * n_hid_p * n_hid_p + n_hid_p * n_out)    # bf16 weights
        + 4 * (4 * n_hid_p + n_out)                                         # f32 biases + rxn row
    )

    kernel = functools.partial(_birxn_mlp_kernel,
                               act_dtype=act_dtype, compute_dtype=compute_dtype)

    out = pl.pallas_call(
        kernel,
        out_shape=jax.ShapeDtypeStruct((B_p, n_out), jnp.float32),
        grid_spec=grid_spec,
        compiler_params=pltpu.CompilerParams(
            dimension_semantics=("parallel",)),    # batch tiles independent -> dual TC ok
        cost_estimate=pl.CostEstimate(flops=flops, transcendentals=0,
                                      bytes_accessed=bytes_accessed),
    )(idx, state, prep["rxn"], prep["ws"], prep["bs"],
      prep["w0"], prep["b0"], prep["w1"], prep["b1"], prep["w2"], prep["b2"])

    return out if B_p == B else out[:B]


def init_params(key, n_in, n_bi_rxn, n_hid, n_out):
    """Deterministic synthetic parameter init (weights stored as (in, out))."""
    ks = jax.random.split(key, 9)
    scale = 0.1
    return {
        "ws": scale * jax.random.normal(ks[0], (n_in, n_hid), jnp.float32),
        "bs": scale * jax.random.normal(ks[1], (1, n_hid), jnp.float32),
        "rxn_table": scale * jax.random.normal(ks[2], (n_bi_rxn, n_hid), jnp.float32),
        "w0": scale * jax.random.normal(ks[3], (n_hid, n_hid), jnp.float32),
        "b0": scale * jax.random.normal(ks[4], (1, n_hid), jnp.float32),
        "w1": scale * jax.random.normal(ks[5], (n_hid, n_hid), jnp.float32),
        "b1": scale * jax.random.normal(ks[6], (1, n_hid), jnp.float32),
        "w2": scale * jax.random.normal(ks[7], (n_hid, n_out), jnp.float32),
        "b2": scale * jax.random.normal(ks[8], (1, n_out), jnp.float32),
    }


def reference_forward_quantized(state, bi_rxn_idx, params,
                                act_dtype=jnp.float32, compute_dtype=jnp.bfloat16):
    """Pure-JAX reference mirroring the kernel's bf16-matmul / f32-accum scheme."""
    cd = compute_dtype

    def dot(x, w):
        return jnp.dot(x.astype(cd), w.astype(cd), preferred_element_type=jnp.float32)

    def act(h):
        return _leaky_relu(h.astype(act_dtype)).astype(jnp.float32)

    bias0 = params["bs"] + params["rxn_table"][bi_rxn_idx][None, :]
    h = act(dot(state, params["ws"]) + bias0)
    h = act(dot(h, params["w0"]) + params["b0"])
    h = act(dot(h, params["w1"]) + params["b1"])
    return dot(h, params["w2"]) + params["b2"]


def reference_forward_f32(state, bi_rxn_idx, params):
    """Full-precision reference mirroring the PyTorch module semantics."""
    h = state @ params["ws"] + params["bs"]
    h = h + params["rxn_table"][bi_rxn_idx][None, :]
    h = _leaky_relu(h)
    h = _leaky_relu(h @ params["w0"] + params["b0"])
    h = _leaky_relu(h @ params["w1"] + params["b1"])
    return h @ params["w2"] + params["b2"]


if __name__ == "__main__":
    # Module-consistent shapes; batch large enough to exercise the batch tiling.
    B, n_in, n_bi_rxn, n_hid, n_out = 512, 32, 4, 32, 16   # n_layer = 2 -> 3 Linears

    key = jax.random.PRNGKey(0)
    k_state, k_params = jax.random.split(key)
    state = jax.random.normal(k_state, (B, n_in), jnp.float32)
    params = init_params(k_params, n_in, n_bi_rxn, n_hid, n_out)
    bi_rxn_idx = 2

    prep = prepare_params(params)            # one-time pad/cast (hoisted out of forward)
    act_dtype = _default_act_dtype()         # bf16 activations on v6e/v7x, f32 on v5e

    out = birxn_mlp_forward(state, bi_rxn_idx, prep, act_dtype=act_dtype)
    out = jax.block_until_ready(out)
    assert out.shape == (B, n_out)

    # Tight check against a reference that uses the same bf16/f32 arithmetic.
    ref_q = reference_forward_quantized(state, bi_rxn_idx, params, act_dtype=act_dtype)
    assert jnp.allclose(out, ref_q, atol=2e-3, rtol=2e-3), "mismatch vs quantized ref"

    # Loose check against the full-f32 PyTorch-equivalent reference.
    ref_f = reference_forward_f32(state, bi_rxn_idx, params)
    assert jnp.allclose(out, ref_f, atol=5e-2, rtol=5e-2), "mismatch vs f32 ref"

    print("KERNEL_OK")
</pallas_src>

<mosaic_0001>
module attributes {stable_mosaic.version = 11 : i64} {
  func.func @_birxn_mlp_kernel(%arg0: i32, %arg1: memref<1xi32, #tpu.memory_space<smem>>, %arg2: memref<512x32xf32, #tpu.memory_space<vmem>>, %arg3: memref<1x1x128xf32, #tpu.memory_space<vmem>>, %arg4: memref<32x128xbf16, #tpu.memory_space<vmem>>, %arg5: memref<1x128xf32, #tpu.memory_space<vmem>>, %arg6: memref<128x128xbf16, #tpu.memory_space<vmem>>, %arg7: memref<1x128xf32, #tpu.memory_space<vmem>>, %arg8: memref<128x128xbf16, #tpu.memory_space<vmem>>, %arg9: memref<1x128xf32, #tpu.memory_space<vmem>>, %arg10: memref<128x16xbf16, #tpu.memory_space<vmem>>, %arg11: memref<1x16xf32, #tpu.memory_space<vmem>>, %arg12: memref<512x16xf32, #tpu.memory_space<vmem>>) attributes {dimension_semantics = [#tpu.dimension_semantics<parallel>], iteration_bounds = array<i64: 1>, scalar_prefetch = 1 : i64, scratch_operands = 0 : i64, tpu.core_type = #tpu.core_type<tc>, window_params = [{transform_indices = @transform_0, window_bounds = array<i64: 512, 32>}, {transform_indices = @transform_1, window_bounds = array<i64: 1, 1, 128>}, {pipeline_mode = #tpu.pipeline_mode<synchronous>, transform_indices = @transform_2, window_bounds = array<i64: 32, 128>}, {pipeline_mode = #tpu.pipeline_mode<synchronous>, transform_indices = @transform_3, window_bounds = array<i64: 1, 128>}, {pipeline_mode = #tpu.pipeline_mode<synchronous>, transform_indices = @transform_4, window_bounds = array<i64: 128, 128>}, {pipeline_mode = #tpu.pipeline_mode<synchronous>, transform_indices = @transform_5, window_bounds = array<i64: 1, 128>}, {pipeline_mode = #tpu.pipeline_mode<synchronous>, transform_indices = @transform_6, window_bounds = array<i64: 128, 128>}, {pipeline_mode = #tpu.pipeline_mode<synchronous>, transform_indices = @transform_7, window_bounds = array<i64: 1, 128>}, {pipeline_mode = #tpu.pipeline_mode<synchronous>, transform_indices = @transform_8, window_bounds = array<i64: 128, 16>}, {pipeline_mode = #tpu.pipeline_mode<synchronous>, transform_indices = @transform_9, window_bounds = array<i64: 1, 16>}, {transform_indices = @transform_10, window_bounds = array<i64: 512, 16>}]} {
    %c0 = arith.constant 0 : index
    %c0_0 = arith.constant 0 : index
    %0 = vector.load %arg5[%c0, %c0_0] : memref<1x128xf32, #tpu.memory_space<vmem>>, vector<1x128xf32>
    %c0_1 = arith.constant 0 : index
    %c0_2 = arith.constant 0 : index
    %c0_3 = arith.constant 0 : index
    %1 = vector.load %arg3[%c0_1, %c0_2, %c0_3] : memref<1x1x128xf32, #tpu.memory_space<vmem>>, vector<1x1x128xf32>
    %2 = vector.shape_cast %1 : vector<1x1x128xf32> to vector<1x128xf32>
    %3 = arith.addf %0, %2 : vector<1x128xf32>
    %c0_4 = arith.constant 0 : index
    %c0_5 = arith.constant 0 : index
    %4 = vector.load %arg2[%c0_4, %c0_5] : memref<512x32xf32, #tpu.memory_space<vmem>>, vector<512x32xf32>
    %5 = arith.truncf %4 : vector<512x32xf32> to vector<512x32xbf16>
    %c0_6 = arith.constant 0 : index
    %c0_7 = arith.constant 0 : index
    %6 = vector.load %arg4[%c0_6, %c0_7] : memref<32x128xbf16, #tpu.memory_space<vmem>>, vector<32x128xbf16>
    %cst = arith.constant dense<0.000000e+00> : vector<512x128xf32>
    %7 = tpu.matmul %5, %6, %cst {dimension_numbers = #tpu.dot_dimension_numbers<[1], [0], [0], [1], [0, 0, 1, 1], [], []>} : vector<512x32xbf16>, vector<32x128xbf16>, vector<512x128xf32> -> vector<512x128xf32>
    %8 = vector.broadcast %3 : vector<1x128xf32> to vector<512x128xf32>
    %9 = arith.addf %7, %8 : vector<512x128xf32>
    %cst_8 = arith.constant 0.000000e+00 : f32
    %10 = vector.broadcast %cst_8 : f32 to vector<512x128xf32>
    %11 = arith.cmpf oge, %9, %10 : vector<512x128xf32>
    %cst_9 = arith.constant 0.00999999977 : f32
    %12 = vector.broadcast %cst_9 : f32 to vector<512x128xf32>
    %13 = arith.mulf %12, %9 : vector<512x128xf32>
    %14 = arith.select %11, %9, %13 : vector<512x128xi1>, vector<512x128xf32>
    %15 = arith.truncf %14 : vector<512x128xf32> to vector<512x128xbf16>
    %c0_10 = arith.constant 0 : index
    %c0_11 = arith.constant 0 : index
    %16 = vector.load %arg6[%c0_10, %c0_11] : memref<128x128xbf16, #tpu.memory_space<vmem>>, vector<128x128xbf16>
    %cst_12 = arith.constant dense<0.000000e+00> : vector<512x128xf32>
    %17 = tpu.matmul %15, %16, %cst_12 {dimension_numbers = #tpu.dot_dimension_numbers<[1], [0], [0], [1], [0, 0, 1, 1], [], []>} : vector<512x128xbf16>, vector<128x128xbf16>, vector<512x128xf32> -> vector<512x128xf32>
    %c0_13 = arith.constant 0 : index
    %c0_14 = arith.constant 0 : index
    %18 = vector.load %arg7[%c0_13, %c0_14] : memref<1x128xf32, #tpu.memory_space<vmem>>, vector<1x128xf32>
    %19 = vector.broadcast %18 : vector<1x128xf32> to vector<512x128xf32>
    %20 = arith.addf %17, %19 : vector<512x128xf32>
    %cst_15 = arith.constant 0.000000e+00 : f32
    %21 = vector.broadcast %cst_15 : f32 to vector<512x128xf32>
    %22 = arith.cmpf oge, %20, %21 : vector<512x128xf32>
    %cst_16 = arith.constant 0.00999999977 : f32
    %23 = vector.broadcast %cst_16 : f32 to vector<512x128xf32>
    %24 = arith.mulf %23, %20 : vector<512x128xf32>
    %25 = arith.select %22, %20, %24 : vector<512x128xi1>, vector<512x128xf32>
    %26 = arith.truncf %25 : vector<512x128xf32> to vector<512x128xbf16>
    %c0_17 = arith.constant 0 : index
    %c0_18 = arith.constant 0 : index
    %27 = vector.load %arg8[%c0_17, %c0_18] : memref<128x128xbf16, #tpu.memory_space<vmem>>, vector<128x128xbf16>
    %cst_19 = arith.constant dense<0.000000e+00> : vector<512x128xf32>
    %28 = tpu.matmul %26, %27, %cst_19 {dimension_numbers = #tpu.dot_dimension_numbers<[1], [0], [0], [1], [0, 0, 1, 1], [], []>} : vector<512x128xbf16>, vector<128x128xbf16>, vector<512x128xf32> -> vector<512x128xf32>
    %c0_20 = arith.constant 0 : index
    %c0_21 = arith.constant 0 : index
    %29 = vector.load %arg9[%c0_20, %c0_21] : memref<1x128xf32, #tpu.memory_space<vmem>>, vector<1x128xf32>
    %30 = vector.broadcast %29 : vector<1x128xf32> to vector<512x128xf32>
    %31 = arith.addf %28, %30 : vector<512x128xf32>
    %cst_22 = arith.constant 0.000000e+00 : f32
    %32 = vector.broadcast %cst_22 : f32 to vector<512x128xf32>
    %33 = arith.cmpf oge, %31, %32 : vector<512x128xf32>
    %cst_23 = arith.constant 0.00999999977 : f32
    %34 = vector.broadcast %cst_23 : f32 to vector<512x128xf32>
    %35 = arith.mulf %34, %31 : vector<512x128xf32>
    %36 = arith.select %33, %31, %35 : vector<512x128xi1>, vector<512x128xf32>
    %37 = arith.truncf %36 : vector<512x128xf32> to vector<512x128xbf16>
    %c0_24 = arith.constant 0 : index
    %c0_25 = arith.constant 0 : index
    %38 = vector.load %arg10[%c0_24, %c0_25] : memref<128x16xbf16, #tpu.memory_space<vmem>>, vector<128x16xbf16>
    %cst_26 = arith.constant dense<0.000000e+00> : vector<512x16xf32>
    %39 = tpu.matmul %37, %38, %cst_26 {dimension_numbers = #tpu.dot_dimension_numbers<[1], [0], [0], [1], [0, 0, 1, 1], [], []>} : vector<512x128xbf16>, vector<128x16xbf16>, vector<512x16xf32> -> vector<512x16xf32>
    %c0_27 = arith.constant 0 : index
    %c0_28 = arith.constant 0 : index
    %40 = vector.load %arg11[%c0_27, %c0_28] : memref<1x16xf32, #tpu.memory_space<vmem>>, vector<1x16xf32>
    %41 = vector.broadcast %40 : vector<1x16xf32> to vector<512x16xf32>
    %42 = arith.addf %39, %41 : vector<512x16xf32>
    %c0_29 = arith.constant 0 : index
    %c0_30 = arith.constant 0 : index
    %43 = vector.load %arg12[%c0_29, %c0_30] : memref<512x16xf32, #tpu.memory_space<vmem>>, vector<512x16xf32>
    tpu.vector_store %arg12[%c0_29, %c0_30], %42 {strides = array<i32>} : memref<512x16xf32, #tpu.memory_space<vmem>>, vector<512x16xf32>,
    return
  }
  func.func @transform_0(%arg0: i32, %arg1: memref<1xi32, #tpu.memory_space<smem>>) -> (i32, i32) {
    %c0_i32 = arith.constant 0 : i32
    %c0_i32_0 = arith.constant 0 : i32
    return %arg0, %c0_i32 : i32, i32
  }
  func.func @transform_1(%arg0: i32, %arg1: memref<1xi32, #tpu.memory_space<smem>>) -> (i32, i32, i32) {
    %c0 = arith.constant 0 : index
    %0 = memref.load %arg1[%c0] : memref<1xi32, #tpu.memory_space<smem>>
    %c0_i32 = arith.constant 0 : i32
    %c0_i32_0 = arith.constant 0 : i32
    %c0_i32_1 = arith.constant 0 : i32
    return %0, %c0_i32, %c0_i32_0 : i32, i32, i32
  }
  func.func @transform_2(%arg0: i32, %arg1: memref<1xi32, #tpu.memory_space<smem>>) -> (i32, i32) {
    %c0_i32 = arith.constant 0 : i32
    %c0_i32_0 = arith.constant 0 : i32
    %c0_i32_1 = arith.constant 0 : i32
    return %c0_i32, %c0_i32_0 : i32, i32
  }
  func.func @transform_3(%arg0: i32, %arg1: memref<1xi32, #tpu.memory_space<smem>>) -> (i32, i32) {
    %c0_i32 = arith.constant 0 : i32
    %c0_i32_0 = arith.constant 0 : i32
    %c0_i32_1 = arith.constant 0 : i32
    return %c0_i32, %c0_i32_0 : i32, i32
  }
  func.func @transform_4(%arg0: i32, %arg1: memref<1xi32, #tpu.memory_space<smem>>) -> (i32, i32) {
    %c0_i32 = arith.constant 0 : i32
    %c0_i32_0 = arith.constant 0 : i32
    %c0_i32_1 = arith.constant 0 : i32
    return %c0_i32, %c0_i32_0 : i32, i32
  }
  func.func @transform_5(%arg0: i32, %arg1: memref<1xi32, #tpu.memory_space<smem>>) -> (i32, i32) {
    %c0_i32 = arith.constant 0 : i32
    %c0_i32_0 = arith.constant 0 : i32
    %c0_i32_1 = arith.constant 0 : i32
    return %c0_i32, %c0_i32_0 : i32, i32
  }
  func.func @transform_6(%arg0: i32, %arg1: memref<1xi32, #tpu.memory_space<smem>>) -> (i32, i32) {
    %c0_i32 = arith.constant 0 : i32
    %c0_i32_0 = arith.constant 0 : i32
    %c0_i32_1 = arith.constant 0 : i32
    return %c0_i32, %c0_i32_0 : i32, i32
  }
  func.func @transform_7(%arg0: i32, %arg1: memref<1xi32, #tpu.memory_space<smem>>) -> (i32, i32) {
    %c0_i32 = arith.constant 0 : i32
    %c0_i32_0 = arith.constant 0 : i32
    %c0_i32_1 = arith.constant 0 : i32
    return %c0_i32, %c0_i32_0 : i32, i32
  }
  func.func @transform_8(%arg0: i32, %arg1: memref<1xi32, #tpu.memory_space<smem>>) -> (i32, i32) {
    %c0_i32 = arith.constant 0 : i32
    %c0_i32_0 = arith.constant 0 : i32
    %c0_i32_1 = arith.constant 0 : i32
    return %c0_i32, %c0_i32_0 : i32, i32
  }
  func.func @transform_9(%arg0: i32, %arg1: memref<1xi32, #tpu.memory_space<smem>>) -> (i32, i32) {
    %c0_i32 = arith.constant 0 : i32
    %c0_i32_0 = arith.constant 0 : i32
    %c0_i32_1 = arith.constant 0 : i32
    return %c0_i32, %c0_i32_0 : i32, i32
  }
  func.func @transform_10(%arg0: i32, %arg1: memref<1xi32, #tpu.memory_space<smem>>) -> (i32, i32) {
    %c0_i32 = arith.constant 0 : i32
    %c0_i32_0 = arith.constant 0 : i32
    return %arg0, %c0_i32 : i32, i32
  }
}

</mosaic_0001>

<bundles_post_ra>
// kernel: tpu_custom_call.1
= control target key start
LH: loop header
LB: loop body
LE: loop exit
PB: predicated region body
PF: predicated region fallthrough
CT: control target
= control target key end

     0   :  { %vm173_vm0 = vcmask 261120   ;;  %s3887_s3 = inlined_call_operand.vmem [shape: bf16[32,128], index: 3, kind: input, shape index: {}]   ;;  %s3888_s1 = inlined_call_operand.vmem [shape: f32[512,32], index: 1, kind: input, shape index: {}]   ;;  %s3889_s5 = inlined_call_operand.vmem [shape: bf16[128,128], index: 5, kind: input, shape index: {}]   ;;  %s3890_s0 = inlined_call_operand.<no memory space> [shape: s32[1], index: 0, kind: input, shape index: {}]   ;;  %s3891_s7 = inlined_call_operand.vmem [shape: bf16[128,128], index: 7, kind: input, shape index: {}]   ;;  %s3892_s2 = inlined_call_operand.vmem [shape: f32[4,1,128], index: 2, kind: input, shape index: {}]   ;;  %s3893_s4 = inlined_call_operand.vmem [shape: f32[1,128], index: 4, kind: input, shape index: {}]   ;;  %s3894_s9 = inlined_call_operand.vmem [shape: bf16[128,16], index: 9, kind: input, shape index: {}]   ;;  %s3895_s6 = inlined_call_operand.vmem [shape: f32[1,128], index: 6, kind: input, shape index: {}]   ;;  %s3896_s8 = inlined_call_operand.vmem [shape: f32[1,128], index: 8, kind: input, shape index: {}]   ;;  %s3897_s10 = inlined_call_operand.vmem [shape: f32[1,16], index: 10, kind: input, shape index: {}]   ;;  %s3898_s11 = inlined_call_operand.vmem [shape: f32[512,16], index: 11, kind: output, shape index: {}]  }
   0x1   :  { %v2922_v0 = vld [vmem:[%s3887_s3] sm:$0xff]   ;;  %v2923_v1 = vld [vmem:[%s3887_s3 + $0x8] sm:$0xff]   ;;  %v57_v5 = vld [vmem:[%s3888_s1 + $0x10] sm:$0xff]  ;;  %p47_p0 = scmp.lt.s32.totalorder %s3890_s0, 3 }
   0x2   :  { %2598 = vmatprep.subr.bf16.mxu0 %v2922_v0  ;;  %v55_v2 = vld [vmem:[%s3888_s1] sm:$0xff]  ;;  %v56_v3 = vld [vmem:[%s3888_s1 + $0x8] sm:$0xff]  ;;  %v58_v6 = vld [vmem:[%s3888_s1 + $0x18] sm:$0xff] }
   0x3   :  { %2599 = vmatpush3.bf16.msra.mxu0 %v2922_v0  ;;  %v119_v4 = vpack.c.bf16 %v56_v3, %v55_v2  ;;  %v59_v7 = vld [vmem:[%s3888_s1 + $0x20] sm:$0xff]  ;;  %v60_v8 = vld [vmem:[%s3888_s1 + $0x28] sm:$0xff]  ;;  %v120_v9 = vpack.c.bf16 %v58_v6, %v57_v5  ;;  %v61_v11 = vld [vmem:[%s3888_s1 + $0x30] sm:$0xff]  ;;  %s3900_s0 = smov (!%p47_p0, %s3890_s0), 3 }
   0x4   :  { %2600 = vmatprep.subr.bf16.mxu0 %v2923_v1  ;;  %v121_v10 = vpack.c.bf16 %v60_v8, %v59_v7  ;;  %v62_v12 = vld [vmem:[%s3888_s1 + $0x38] sm:$0xff]  ;;  %v63_v13 = vld [vmem:[%s3888_s1 + $0x40] sm:$0xff]  ;;  %v64_v14 = vld [vmem:[%s3888_s1 + $0x48] sm:$0xff]  ;;  %s49_s29 = scalar_lea.vmem %s3892_s2, %s3900_s0 }
   0x5   :  { %2602 = vmatprep.mubr.msk.bf16.mxu0 %vm173_vm0, %v119_v4  ;;  %v122_v15 = vpack.c.bf16 %v62_v12, %v61_v11  ;;  %v123_v16 = vpack.c.bf16 %v64_v14, %v63_v13  ;;  %v65_v17 = vld [vmem:[%s3888_s1 + $0x50] sm:$0xff]  ;;  %v66_v18 = vld [vmem:[%s3888_s1 + $0x58] sm:$0xff]  ;;  %v67_v19 = vld [vmem:[%s3888_s1 + $0x60] sm:$0xff] }
   0x6   :  { %v68_v20 = vld [vmem:[%s3888_s1 + $0x68] sm:$0xff]  ;;  %v124_v21 = vpack.c.bf16 %v66_v18, %v65_v17  ;;  %v2924_v23 = vld [vmem:[%s3889_s5] sm:$0xff]   ;;  %v69_v25 = vld [vmem:[%s3888_s1 + $0x70] sm:$0xff] }
   0x7   :  { %2601 = vmatpush3.bf16.msra.mxu0 %v2923_v1  ;;  %v125_v22 = vpack.c.bf16 %v68_v20, %v67_v19  ;;  %v2925_v24 = vld [vmem:[%s3889_s5 + $0x8] sm:$0xff]   ;;  %2666 = vmatprep.subr.bf16.mxu1 %v2924_v23  ;;  %v70_v26 = vld [vmem:[%s3888_s1 + $0x78] sm:$0xff]  ;;  %v71_v27 = vld [vmem:[%s3888_s1 + $0x80] sm:$0xff] }
   0x8   :  { %2667 = vmatpush3.bf16.msra.mxu1 %v2924_v23  ;;  %v72_v28 = vld [vmem:[%s3888_s1 + $0x88] sm:$0xff]  ;;  %v2926_v29 = vld [vmem:[%s3889_s5 + $0x10] sm:$0xff]   ;;  %v126_v30 = vpack.c.bf16 %v70_v26, %v69_v25  ;;  %v2927_v32 = vld [vmem:[%s3889_s5 + $0x18] sm:$0xff]  }
   0x9   :  { %2668 = vmatprep.subr.bf16.mxu1 %v2925_v24  ;;  %v127_v31 = vpack.c.bf16 %v72_v28, %v71_v27  ;;  %v73_v33 = vld [vmem:[%s3888_s1 + $0x90] sm:$0xff]  ;;  %v74_v34 = vld [vmem:[%s3888_s1 + $0x98] sm:$0xff]  ;;  %v75_v35 = vld [vmem:[%s3888_s1 + $0xa0] sm:$0xff] }
   0xa   :  { %2603 = vmatmul.mubr.msk.bf16.vlgmr.msra.gmra.mrb[0].mxu0 %vm173_vm0, %v120_v9  ;;  %v76_v36 = vld [vmem:[%s3888_s1 + $0xa8] sm:$0xff]  ;;  %v2928_v37 = vld [vmem:[%s3889_s5 + $0x20] sm:$0xff]   ;;  %v128_v38 = vpack.c.bf16 %v74_v34, %v73_v33  ;;  %v77_v40 = vld [vmem:[%s3888_s1 + $0xb0] sm:$0xff] }
   0xb   :  { %2606 = vmatprep.mubr.msk.bf16.mxu0 %vm173_vm0, %v121_v10  ;;  %v129_v39 = vpack.c.bf16 %v76_v36, %v75_v35  ;;  %v78_v41 = vld [vmem:[%s3888_s1 + $0xb8] sm:$0xff]  ;;  %v79_v42 = vld [vmem:[%s3888_s1 + $0xc0] sm:$0xff]  ;;  %v80_v43 = vld [vmem:[%s3888_s1 + $0xc8] sm:$0xff] }
   0xc   :  { %2669 = vmatpush3.bf16.msra.mxu1 %v2925_v24  ;;  %v130_v44 = vpack.c.bf16 %v78_v41, %v77_v40  ;;  %v131_v45 = vpack.c.bf16 %v80_v43, %v79_v42  ;;  %v81_v46 = vld [vmem:[%s3888_s1 + $0xd0] sm:$0xff]  ;;  %v82_v47 = vld [vmem:[%s3888_s1 + $0xd8] sm:$0xff]  ;;  %v83_v48 = vld [vmem:[%s3888_s1 + $0xe0] sm:$0xff]  ;;  %v156_v43 = vlaneseq }
   0xd   :  { %2670 = vmatprep.subr.bf16.mxu1 %v2926_v29  ;;  %v84_v49 = vld [vmem:[%s3888_s1 + $0xe8] sm:$0xff]  ;;  %v132_v50 = vpack.c.bf16 %v82_v47, %v81_v46  ;;  %v85_v52 = vld [vmem:[%s3888_s1 + $0xf0] sm:$0xff]  ;;  %v86_v53 = vld [vmem:[%s3888_s1 + $0xf8] sm:$0xff] }
   0xe   :  { %v133_v51 = vpack.c.bf16 %v84_v49, %v83_v48  ;;  %v87_v54 = vld [vmem:[%s3888_s1 + $0x100] sm:$0xff]  ;;  %v88_v55 = vld [vmem:[%s3888_s1 + $0x108] sm:$0xff]  ;;  %v134_v56 = vpack.c.bf16 %v86_v53, %v85_v52  ;;  %v89_v58 = vld [vmem:[%s3888_s1 + $0x110] sm:$0xff] }
   0xf   :  { %v135_v57 = vpack.c.bf16 %v88_v55, %v87_v54  ;;  %v90_v59 = vld [vmem:[%s3888_s1 + $0x118] sm:$0xff]  ;;  %v91_v60 = vld [vmem:[%s3888_s1 + $0x120] sm:$0xff]  ;;  %v92_v61 = vld [vmem:[%s3888_s1 + $0x128] sm:$0xff] }
  0x10   :  { %2671 = vmatpush3.bf16.msra.mxu1 %v2926_v29  ;;  %v136_v62 = vpack.c.bf16 %v90_v59, %v89_v58  ;;  %v137_v63 = vpack.c.bf16 %v92_v61, %v91_v60  ;;  %v93_v0 = vld [vmem:[%s3888_s1 + $0x130] sm:$0xff]  ;;  %v94_v1 = vld [vmem:[%s3888_s1 + $0x138] sm:$0xff]  ;;  %v95_v2 = vld [vmem:[%s3888_s1 + $0x140] sm:$0xff] }
  0x11   :  { %2672 = vmatprep.subr.bf16.mxu1 %v2927_v32  ;;  %v96_v3 = vld [vmem:[%s3888_s1 + $0x148] sm:$0xff]  ;;  %v138_v4 = vpack.c.bf16 %v94_v1, %v93_v0  ;;  %v97_v6 = vld [vmem:[%s3888_s1 + $0x150] sm:$0xff]  ;;  %v98_v7 = vld [vmem:[%s3888_s1 + $0x158] sm:$0xff] }
  0x12   :  { %2607 = vmatmul.mubr.msk.bf16.gmra.mrb[4].mxu0 %vm173_vm0, %v122_v15  ;;  %v139_v5 = vpack.c.bf16 %v96_v3, %v95_v2  ;;  %v99_v8 = vld [vmem:[%s3888_s1 + $0x160] sm:$0xff]  ;;  %v100_v9 = vld [vmem:[%s3888_s1 + $0x168] sm:$0xff]  ;;  %v140_v10 = vpack.c.bf16 %v98_v7, %v97_v6  ;;  %v101_v12 = vld [vmem:[%s3888_s1 + $0x170] sm:$0xff] }
  0x13   :  { %2610 = vmatprep.mubr.msk.bf16.mxu0 %vm173_vm0, %v123_v16  ;;  %v141_v11 = vpack.c.bf16 %v100_v9, %v99_v8  ;;  %v102_v13 = vld [vmem:[%s3888_s1 + $0x178] sm:$0xff]  ;;  %v2929_v14 = vld [vmem:[%s3889_s5 + $0x28] sm:$0xff]   ;;  %v103_v15 = vld [vmem:[%s3888_s1 + $0x180] sm:$0xff] }
  0x14   :  { %2673 = vmatpush3.bf16.msra.mxu1 %v2927_v32  ;;  %v104_v16 = vld [vmem:[%s3888_s1 + $0x188] sm:$0xff]  ;;  %v142_v17 = vpack.c.bf16 %v102_v13, %v101_v12  ;;  %v2930_v19 = vld [vmem:[%s3889_s5 + $0x30] sm:$0xff]   ;;  %v107_v23 = vld [vmem:[%s3888_s1 + $0x1a0] sm:$0xff] }
  0x15   :  { %2674 = vmatprep.subr.bf16.mxu1 %v2928_v37  ;;  %v143_v18 = vpack.c.bf16 %v104_v16, %v103_v15  ;;  %v105_v20 = vld [vmem:[%s3888_s1 + $0x190] sm:$0xff]  ;;  %v108_v24 = vld [vmem:[%s3888_s1 + $0x1a8] sm:$0xff]  ;;  %v110_v28 = vld [vmem:[%s3888_s1 + $0x1b8] sm:$0xff] }
  0x16   :  { %v145_v26 = vpack.c.bf16 %v108_v24, %v107_v23  ;;  %v109_v27 = vld [vmem:[%s3888_s1 + $0x1b0] sm:$0xff]  ;;  %v111_v29 = vld [vmem:[%s3888_s1 + $0x1c0] sm:$0xff]  ;;  %v114_v34 = vld [vmem:[%s3888_s1 + $0x1d8] sm:$0xff] }
  0x17   :  { %v113_v33 = vld [vmem:[%s3888_s1 + $0x1d0] sm:$0xff]  ;;  %v115_v35 = vld [vmem:[%s3888_s1 + $0x1e0] sm:$0xff]  ;;  %v116_v36 = vld [vmem:[%s3888_s1 + $0x1e8] sm:$0xff] }
  0x18   :  { %2675 = vmatpush3.bf16.msra.mxu1 %v2928_v37  ;;  %v148_v37 = vpack.c.bf16 %v114_v34, %v113_v33  ;;  %v118_v40 = vld [vmem:[%s3888_s1 + $0x1f8] sm:$0xff]  ;;  %v2932_v42 = vld [vmem:[%s3891_s7] sm:$0xff]   ;;  %v2934_v61 = vld [vmem:[%s3891_s7 + $0x10] sm:$0xff]  }
  0x19   :  { %2676 = vmatprep.subr.bf16.mxu1 %v2929_v14  ;;  %2746 = vmatprep.subr.bf16.mxu0 %v2932_v42  ;;  %v53_v46 = vld [vmem:[%s49_s29] sm:$0x1] }
  0x1a   :  { %2611 = vmatmul.mubr.msk.bf16.gmra.mrb[8].mxu0 %vm173_vm0, %v124_v21  ;;  %v106_v21 = vld [vmem:[%s3888_s1 + $0x198] sm:$0xff]  ;;  %v2936_v7 = vld [vmem:[%s3891_s7 + $0x20] sm:$0xff]  }
  0x1b   :  { %2614 = vmatprep.mubr.msk.bf16.mxu0 %vm173_vm0, %v125_v22  ;;  %v2931_v22 = vld [vmem:[%s3889_s5 + $0x38] sm:$0xff]   ;;  %v144_v25 = vpack.c.bf16 %v106_v21, %v105_v20  ;;  %2747 = vmatpush3.bf16.msra.mxu0 %v2932_v42 }
  0x1c   :  { %2677 = vmatpush3.bf16.msra.mxu1 %v2929_v14 }
  0x1d   :  { %2678 = vmatprep.subr.bf16.mxu1 %v2930_v19 }
  0x20   :  { %2679 = vmatpush3.bf16.msra.mxu1 %v2930_v19 }
  0x21   :  { %2680 = vmatprep.subr.bf16.mxu1 %v2931_v22 }
  0x22   :  { %2615 = vmatmul.mubr.msk.bf16.gmra.mrb[12].mxu0 %vm173_vm0, %v126_v30  ;;  %v112_v30 = vld [vmem:[%s3888_s1 + $0x1c8] sm:$0xff] }
  0x23   :  { %2618 = vmatprep.mubr.msk.bf16.mxu0 %vm173_vm0, %v127_v31  ;;  %v146_v31 = vpack.c.bf16 %v110_v28, %v109_v27  ;;  %v147_v32 = vpack.c.bf16 %v112_v30, %v111_v29  ;;  %v2938_v27 = vld [vmem:[%s3891_s7 + $0x30] sm:$0xff]  }
  0x24   :  { %2681 = vmatpush3.bf16.msra.mxu1 %v2931_v22 }
  0x2a   :  { %2619 = vmatmul.mubr.msk.bf16.gmra.mrb[16].mxu0 %vm173_vm0, %v128_v38  ;;  %v149_v38 = vpack.c.bf16 %v116_v36, %v115_v35 }
  0x2b   :  { %2622 = vmatprep.mubr.msk.bf16.mxu0 %vm173_vm0, %v129_v39  ;;  %v117_v39 = vld [vmem:[%s3888_s1 + $0x1f0] sm:$0xff] }
  0x2c   :  { %v150_v41 = vpack.c.bf16 %v118_v40, %v117_v39 }
  0x32   :  { %2623 = vmatmul.mubr.msk.bf16.gmra.mrb[20].mxu0 %vm173_vm0, %v130_v44  ;;  %v157_v44 = vshrl.u32 %v156_v43, 7 }
  0x33   :  { %2626 = vmatprep.mubr.msk.bf16.mxu0 %vm173_vm0, %v131_v45  ;;  %v52_v45 = vld [vmem:[%s3893_s4] sm:$0x1] }
  0x34   :  { %v54_v47 = vadd.f32 %v53_v46, %v52_v45  ;;  %v158_v48 = vsub.s32 0, %v157_v44 }
  0x36   :  { %v3277_v49 = vrot.slane %v54_v47, %v158_v48 }
  0x3a   :  { %2627 = vmatmul.mubr.msk.bf16.gmra.mrb[24].mxu0 %vm173_vm0, %v132_v50  ;;  %v2933_v50 = vld [vmem:[%s3891_s7 + $0x8] sm:$0xff]  }
  0x3b   :  { %2630 = vmatprep.mubr.msk.bf16.mxu0 %vm173_vm0, %v133_v51  ;;  %2748 = vmatprep.subr.bf16.mxu0 %v2933_v50 }
  0x3c   :  { %2749 = vmatpush3.bf16.msra.mxu0 %v2933_v50 }
  0x3d   :  { %2750 = vmatprep.subr.bf16.mxu0 %v2934_v61 }
  0x40   :  { %2751 = vmatpush3.bf16.msra.mxu0 %v2934_v61 }
  0x42   :  { %2631 = vmatmul.mubr.msk.bf16.gmra.mrb[28].mxu0 %vm173_vm0, %v134_v56 }
  0x43   :  { %2634 = vmatprep.mubr.msk.bf16.mxu0 %vm173_vm0, %v135_v57 }
  0x4a   :  { %2635 = vmatmul.mubr.msk.bf16.gmra.mrb[32].mxu0 %vm173_vm0, %v136_v62  ;;  %v2935_v62 = vld [vmem:[%s3891_s7 + $0x18] sm:$0xff]  }
  0x4b   :  { %2638 = vmatprep.mubr.msk.bf16.mxu0 %vm173_vm0, %v137_v63  ;;  %2752 = vmatprep.subr.bf16.mxu0 %v2935_v62 }
  0x4c   :  { %2753 = vmatpush3.bf16.msra.mxu0 %v2935_v62 }
  0x4d   :  { %2754 = vmatprep.subr.bf16.mxu0 %v2936_v7 }
  0x50   :  { %2755 = vmatpush3.bf16.msra.mxu0 %v2936_v7 }
  0x52   :  { %2639 = vmatmul.mubr.msk.bf16.gmra.mrb[36].mxu0 %vm173_vm0, %v138_v4 }
  0x53   :  { %2642 = vmatprep.mubr.msk.bf16.mxu0 %vm173_vm0, %v139_v5 }
  0x5a   :  { %2643 = vmatmul.mubr.msk.bf16.gmra.mrb[40].mxu0 %vm173_vm0, %v140_v10 }
  0x5b   :  { %2646 = vmatprep.mubr.msk.bf16.mxu0 %vm173_vm0, %v141_v11 }
  0x62   :  { %2647 = vmatmul.mubr.msk.bf16.gmra.mrb[44].mxu0 %vm173_vm0, %v142_v17 }
  0x63   :  { %2650 = vmatprep.mubr.msk.bf16.mxu0 %vm173_vm0, %v143_v18  ;;  %v2937_v18 = vld [vmem:[%s3891_s7 + $0x28] sm:$0xff]  }
  0x64   :  { %2756 = vmatprep.subr.bf16.mxu0 %v2937_v18 }
  0x65   :  { %2757 = vmatpush3.bf16.msra.mxu0 %v2937_v18 }
  0x66   :  { %2758 = vmatprep.subr.bf16.mxu0 %v2938_v27 }
  0x69   :  { %2759 = vmatpush3.bf16.msra.mxu0 %v2938_v27 }
  0x6a   :  { %2651 = vmatmul.mubr.msk.bf16.gmra.mrb[48].mxu0 %vm173_vm0, %v144_v25 }
  0x6b   :  { %2654 = vmatprep.mubr.msk.bf16.mxu0 %vm173_vm0, %v145_v26 }
  0x72   :  { %2655 = vmatmul.mubr.msk.bf16.gmra.mrb[52].mxu0 %vm173_vm0, %v146_v31 }
  0x73   :  { %2658 = vmatprep.mubr.msk.bf16.mxu0 %vm173_vm0, %v147_v32 }
  0x7a   :  { %2659 = vmatmul.mubr.msk.bf16.gmra.mrb[56].mxu0 %vm173_vm0, %v148_v37 }
  0x7b   :  { %2662 = vmatprep.mubr.msk.bf16.mxu0 %vm173_vm0, %v149_v38  ;;  %v2939_v38 = vld [vmem:[%s3891_s7 + $0x38] sm:$0xff]  }
  0x7c   :  { %2760 = vmatprep.subr.bf16.mxu0 %v2939_v38 }
  0x7d   :  { %2761 = vmatpush3.bf16.msra.mxu0 %v2939_v38 }
  0x82   :  { %2663 = vmatmul.mubr.msk.bf16.gmra.mrb[60].mxu0 %vm173_vm0, %v150_v41 }
  0xdd   :  { %v2604_v51 = vpop.f32.mrb[0].mxu0 }
  0xde   :  { %v313_v52 = vadd.f32 %v2604_v51, %v3277_v49  ;;  %v304_v53 = vpop.f32.mrb[1].mxu0 }
  0xdf   :  { %v305_v54 = vadd.f32 %v304_v53, %v3277_v49  ;;  %v2605_v55 = vpop.f32.mrb[2].mxu0 }
  0xe0   :  { %v625_v56 = vmul.f32 0.01, %v313_v52  ;;  %v316_v57 = vadd.f32 %v2605_v55, %v3277_v49  ;;  %v307_v58 = vpop.f32.mrb[3].mxu0  ;;  %vm561_vm1 = vcmp.ge.f32.partialorder %v313_v52, 0.0 }
  0xe1   :  { %v623_v59 = vmul.f32 0.01, %v305_v54  ;;  %v308_v60 = vadd.f32 %v307_v58, %v3277_v49  ;;  %vm559_vm3 = vcmp.ge.f32.partialorder %v305_v54, 0.0 }
  0xe2   :  { %vm562_vm2 = vcmp.ge.f32.partialorder %v316_v57, 0.0  ;;  %v626_v63 = vmul.f32 0.01, %v316_v57  ;;  %v689_v1 = vsel %vm561_vm1, %v313_v52, %v625_v56 }
  0xe3   :  { %v624_v0 = vmul.f32 0.01, %v308_v60  ;;  %vm560_vm4 = vcmp.ge.f32.partialorder %v308_v60, 0.0  ;;  %v687_v4 = vsel %vm559_vm3, %v305_v54, %v623_v59 }
  0xe4   :  { %v690_v2 = vsel %vm562_vm2, %v316_v57, %v626_v63 }
  0xe5   :  { %v2608_v3 = vpop.f32.mrb[4].mxu0  ;;  %v688_v5 = vsel %vm560_vm4, %v308_v60, %v624_v0  ;;  %v752_v6 = vpack.c.bf16 %v690_v2, %v689_v1 }
  0xe6   :  { %v329_v8 = vadd.f32 %v2608_v3, %v3277_v49  ;;  %v320_v9 = vpop.f32.mrb[5].mxu0  ;;  %v751_v10 = vpack.c.bf16 %v688_v5, %v687_v4 }
  0xe7   :  { %v321_v11 = vadd.f32 %v320_v9, %v3277_v49  ;;  %v2609_v12 = vpop.f32.mrb[6].mxu0 }
  0xe8   :  { %v629_v13 = vmul.f32 0.01, %v329_v8  ;;  %v332_v14 = vadd.f32 %v2609_v12, %v3277_v49  ;;  %v323_v15 = vpop.f32.mrb[7].mxu0  ;;  %2682 = vmatprep.mubr.bf16.mxu1 %v751_v10  ;;  %vm565_vm5 = vcmp.ge.f32.partialorder %v329_v8, 0.0 }
  0xe9   :  { %v627_v16 = vmul.f32 0.01, %v321_v11  ;;  %v324_v17 = vadd.f32 %v323_v15, %v3277_v49  ;;  %2683 = vmatmul.mubr.bf16.vlgmr.msra.gmra.mrb[0].mxu1 %v752_v6  ;;  %vm563_vm6 = vcmp.ge.f32.partialorder %v321_v11, 0.0 }
  0xea   :  { %vm566_vm7 = vcmp.ge.f32.partialorder %v332_v14, 0.0  ;;  %v630_v19 = vmul.f32 0.01, %v332_v14  ;;  %v693_v21 = vsel %vm565_vm5, %v329_v8, %v629_v13 }
  0xeb   :  { %vm564_vm8 = vcmp.ge.f32.partialorder %v324_v17, 0.0  ;;  %v628_v20 = vmul.f32 0.01, %v324_v17  ;;  %v691_v24 = vsel %vm563_vm6, %v321_v11, %v627_v16 }
  0xec   :  { %v694_v22 = vsel %vm566_vm7, %v332_v14, %v630_v19 }
  0xed   :  { %v2612_v23 = vpop.f32.mrb[8].mxu0  ;;  %v692_v25 = vsel %vm564_vm8, %v324_v17, %v628_v20  ;;  %v754_v26 = vpack.c.bf16 %v694_v22, %v693_v21 }
  0xee   :  { %v345_v28 = vadd.f32 %v2612_v23, %v3277_v49  ;;  %v336_v29 = vpop.f32.mrb[9].mxu0  ;;  %v753_v30 = vpack.c.bf16 %v692_v25, %v691_v24 }
  0xef   :  { %v337_v31 = vadd.f32 %v336_v29, %v3277_v49  ;;  %v2613_v32 = vpop.f32.mrb[10].mxu0 }
  0xf0   :  { %v633_v33 = vmul.f32 0.01, %v345_v28  ;;  %v348_v34 = vadd.f32 %v2613_v32, %v3277_v49  ;;  %v339_v35 = vpop.f32.mrb[11].mxu0  ;;  %2686 = vmatprep.mubr.bf16.mxu1 %v753_v30  ;;  %vm569_vm9 = vcmp.ge.f32.partialorder %v345_v28, 0.0 }
  0xf1   :  { %v631_v36 = vmul.f32 0.01, %v337_v31  ;;  %v340_v37 = vadd.f32 %v339_v35, %v3277_v49  ;;  %2687 = vmatmul.mubr.bf16.gmra.mrb[4].mxu1 %v754_v26  ;;  %vm567_vm10 = vcmp.ge.f32.partialorder %v337_v31, 0.0 }
  0xf2   :  { %vm570_vm11 = vcmp.ge.f32.partialorder %v348_v34, 0.0  ;;  %v634_v39 = vmul.f32 0.01, %v348_v34  ;;  %v697_v41 = vsel %vm569_vm9, %v345_v28, %v633_v33 }
  0xf3   :  { %vm568_vm12 = vcmp.ge.f32.partialorder %v340_v37, 0.0  ;;  %v632_v40 = vmul.f32 0.01, %v340_v37  ;;  %v695_v44 = vsel %vm567_vm10, %v337_v31, %v631_v36 }
  0xf4   :  { %v698_v42 = vsel %vm570_vm11, %v348_v34, %v634_v39 }
  0xf5   :  { %v2616_v43 = vpop.f32.mrb[12].mxu0  ;;  %v696_v45 = vsel %vm568_vm12, %v340_v37, %v632_v40  ;;  %v756_v46 = vpack.c.bf16 %v698_v42, %v697_v41 }
  0xf6   :  { %v361_v47 = vadd.f32 %v2616_v43, %v3277_v49  ;;  %v352_v48 = vpop.f32.mrb[13].mxu0  ;;  %v755_v50 = vpack.c.bf16 %v696_v45, %v695_v44 }
  0xf7   :  { %v353_v51 = vadd.f32 %v352_v48, %v3277_v49  ;;  %v2617_v52 = vpop.f32.mrb[14].mxu0 }
  0xf8   :  { %v637_v53 = vmul.f32 0.01, %v361_v47  ;;  %v364_v54 = vadd.f32 %v2617_v52, %v3277_v49  ;;  %v355_v55 = vpop.f32.mrb[15].mxu0  ;;  %2690 = vmatprep.mubr.bf16.mxu1 %v755_v50  ;;  %vm573_vm13 = vcmp.ge.f32.partialorder %v361_v47, 0.0 }
  0xf9   :  { %v635_v56 = vmul.f32 0.01, %v353_v51  ;;  %v356_v57 = vadd.f32 %v355_v55, %v3277_v49  ;;  %2691 = vmatmul.mubr.bf16.gmra.mrb[8].mxu1 %v756_v46  ;;  %vm571_vm14 = vcmp.ge.f32.partialorder %v353_v51, 0.0 }
  0xfa   :  { %vm574_vm15 = vcmp.ge.f32.partialorder %v364_v54, 0.0  ;;  %v638_v58 = vmul.f32 0.01, %v364_v54  ;;  %v701_v60 = vsel %vm573_vm13, %v361_v47, %v637_v53 }
  0xfb   :  { %vm572_vm0 = vcmp.ge.f32.partialorder %v356_v57, 0.0  ;;  %v636_v59 = vmul.f32 0.01, %v356_v57  ;;  %v699_v63 = vsel %vm571_vm14, %v353_v51, %v635_v56 }
  0xfc   :  { %v702_v61 = vsel %vm574_vm15, %v364_v54, %v638_v58 }
  0xfd   :  { %v2620_v62 = vpop.f32.mrb[16].mxu0  ;;  %v700_v0 = vsel %vm572_vm0, %v356_v57, %v636_v59  ;;  %v758_v1 = vpack.c.bf16 %v702_v61, %v701_v60 }
  0xfe   :  { %v377_v2 = vadd.f32 %v2620_v62, %v3277_v49  ;;  %v368_v3 = vpop.f32.mrb[17].mxu0  ;;  %v757_v4 = vpack.c.bf16 %v700_v0, %v699_v63 }
  0xff   :  { %v369_v5 = vadd.f32 %v368_v3, %v3277_v49  ;;  %v2621_v6 = vpop.f32.mrb[18].mxu0 }
 0x100   :  { %v641_v7 = vmul.f32 0.01, %v377_v2  ;;  %v380_v8 = vadd.f32 %v2621_v6, %v3277_v49  ;;  %v371_v9 = vpop.f32.mrb[19].mxu0  ;;  %2694 = vmatprep.mubr.bf16.mxu1 %v757_v4  ;;  %vm577_vm1 = vcmp.ge.f32.partialorder %v377_v2, 0.0 }
 0x101   :  { %v639_v10 = vmul.f32 0.01, %v369_v5  ;;  %v372_v11 = vadd.f32 %v371_v9, %v3277_v49  ;;  %2695 = vmatmul.mubr.bf16.gmra.mrb[12].mxu1 %v758_v1  ;;  %vm575_vm2 = vcmp.ge.f32.partialorder %v369_v5, 0.0 }
 0x102   :  { %vm578_vm3 = vcmp.ge.f32.partialorder %v380_v8, 0.0  ;;  %v642_v12 = vmul.f32 0.01, %v380_v8  ;;  %v705_v14 = vsel %vm577_vm1, %v377_v2, %v641_v7 }
 0x103   :  { %vm576_vm4 = vcmp.ge.f32.partialorder %v372_v11, 0.0  ;;  %v640_v13 = vmul.f32 0.01, %v372_v11  ;;  %v703_v17 = vsel %vm575_vm2, %v369_v5, %v639_v10 }
 0x104   :  { %v706_v15 = vsel %vm578_vm3, %v380_v8, %v642_v12 }
 0x105   :  { %v2624_v16 = vpop.f32.mrb[20].mxu0  ;;  %v704_v18 = vsel %vm576_vm4, %v372_v11, %v640_v13  ;;  %v760_v19 = vpack.c.bf16 %v706_v15, %v705_v14 }
 0x106   :  { %v393_v20 = vadd.f32 %v2624_v16, %v3277_v49  ;;  %v384_v21 = vpop.f32.mrb[21].mxu0  ;;  %v759_v22 = vpack.c.bf16 %v704_v18, %v703_v17 }
 0x107   :  { %v385_v23 = vadd.f32 %v384_v21, %v3277_v49  ;;  %v2625_v24 = vpop.f32.mrb[22].mxu0 }
 0x108   :  { %v645_v25 = vmul.f32 0.01, %v393_v20  ;;  %v396_v26 = vadd.f32 %v2625_v24, %v3277_v49  ;;  %v387_v27 = vpop.f32.mrb[23].mxu0  ;;  %2698 = vmatprep.mubr.bf16.mxu1 %v759_v22  ;;  %vm581_vm5 = vcmp.ge.f32.partialorder %v393_v20, 0.0 }
 0x109   :  { %v643_v28 = vmul.f32 0.01, %v385_v23  ;;  %v388_v29 = vadd.f32 %v387_v27, %v3277_v49  ;;  %2699 = vmatmul.mubr.bf16.gmra.mrb[16].mxu1 %v760_v19  ;;  %vm579_vm6 = vcmp.ge.f32.partialorder %v385_v23, 0.0 }
 0x10a   :  { %vm582_vm7 = vcmp.ge.f32.partialorder %v396_v26, 0.0  ;;  %v646_v30 = vmul.f32 0.01, %v396_v26  ;;  %v709_v32 = vsel %vm581_vm5, %v393_v20, %v645_v25 }
 0x10b   :  { %vm580_vm8 = vcmp.ge.f32.partialorder %v388_v29, 0.0  ;;  %v644_v31 = vmul.f32 0.01, %v388_v29  ;;  %v707_v35 = vsel %vm579_vm6, %v385_v23, %v643_v28 }
 0x10c   :  { %v710_v33 = vsel %vm582_vm7, %v396_v26, %v646_v30 }
 0x10d   :  { %v2628_v34 = vpop.f32.mrb[24].mxu0  ;;  %v708_v36 = vsel %vm580_vm8, %v388_v29, %v644_v31  ;;  %v762_v37 = vpack.c.bf16 %v710_v33, %v709_v32 }
 0x10e   :  { %v409_v38 = vadd.f32 %v2628_v34, %v3277_v49  ;;  %v400_v39 = vpop.f32.mrb[25].mxu0  ;;  %v761_v40 = vpack.c.bf16 %v708_v36, %v707_v35 }
 0x10f   :  { %v401_v41 = vadd.f32 %v400_v39, %v3277_v49  ;;  %v2629_v42 = vpop.f32.mrb[26].mxu0 }
 0x110   :  { %v649_v43 = vmul.f32 0.01, %v409_v38  ;;  %v412_v44 = vadd.f32 %v2629_v42, %v3277_v49  ;;  %v403_v45 = vpop.f32.mrb[27].mxu0  ;;  %2702 = vmatprep.mubr.bf16.mxu1 %v761_v40  ;;  %vm585_vm9 = vcmp.ge.f32.partialorder %v409_v38, 0.0 }
 0x111   :  { %v647_v46 = vmul.f32 0.01, %v401_v41  ;;  %v404_v47 = vadd.f32 %v403_v45, %v3277_v49  ;;  %2703 = vmatmul.mubr.bf16.gmra.mrb[20].mxu1 %v762_v37  ;;  %vm583_vm10 = vcmp.ge.f32.partialorder %v401_v41, 0.0 }
 0x112   :  { %vm586_vm11 = vcmp.ge.f32.partialorder %v412_v44, 0.0  ;;  %v650_v48 = vmul.f32 0.01, %v412_v44  ;;  %v713_v51 = vsel %vm585_vm9, %v409_v38, %v649_v43 }
 0x113   :  { %vm584_vm12 = vcmp.ge.f32.partialorder %v404_v47, 0.0  ;;  %v648_v50 = vmul.f32 0.01, %v404_v47  ;;  %v711_v54 = vsel %vm583_vm10, %v401_v41, %v647_v46 }
 0x114   :  { %v714_v52 = vsel %vm586_vm11, %v412_v44, %v650_v48 }
 0x115   :  { %v2632_v53 = vpop.f32.mrb[28].mxu0  ;;  %v712_v55 = vsel %vm584_vm12, %v404_v47, %v648_v50  ;;  %v764_v56 = vpack.c.bf16 %v714_v52, %v713_v51 }
 0x116   :  { %v425_v57 = vadd.f32 %v2632_v53, %v3277_v49  ;;  %v416_v58 = vpop.f32.mrb[29].mxu0  ;;  %v763_v59 = vpack.c.bf16 %v712_v55, %v711_v54 }
 0x117   :  { %v417_v60 = vadd.f32 %v416_v58, %v3277_v49  ;;  %v2633_v61 = vpop.f32.mrb[30].mxu0 }
 0x118   :  { %v653_v62 = vmul.f32 0.01, %v425_v57  ;;  %v428_v63 = vadd.f32 %v2633_v61, %v3277_v49  ;;  %v419_v0 = vpop.f32.mrb[31].mxu0  ;;  %2706 = vmatprep.mubr.bf16.mxu1 %v763_v59  ;;  %vm589_vm13 = vcmp.ge.f32.partialorder %v425_v57, 0.0 }
 0x119   :  { %v651_v1 = vmul.f32 0.01, %v417_v60  ;;  %v420_v2 = vadd.f32 %v419_v0, %v3277_v49  ;;  %2707 = vmatmul.mubr.bf16.gmra.mrb[24].mxu1 %v764_v56  ;;  %vm587_vm14 = vcmp.ge.f32.partialorder %v417_v60, 0.0 }
 0x11a   :  { %vm590_vm15 = vcmp.ge.f32.partialorder %v428_v63, 0.0  ;;  %v654_v3 = vmul.f32 0.01, %v428_v63  ;;  %v717_v5 = vsel %vm589_vm13, %v425_v57, %v653_v62 }
 0x11b   :  { %vm588_vm0 = vcmp.ge.f32.partialorder %v420_v2, 0.0  ;;  %v652_v4 = vmul.f32 0.01, %v420_v2  ;;  %v715_v8 = vsel %vm587_vm14, %v417_v60, %v651_v1 }
 0x11c   :  { %v718_v6 = vsel %vm590_vm15, %v428_v63, %v654_v3 }
 0x11d   :  { %v2636_v7 = vpop.f32.mrb[32].mxu0  ;;  %v716_v9 = vsel %vm588_vm0, %v420_v2, %v652_v4  ;;  %v766_v10 = vpack.c.bf16 %v718_v6, %v717_v5 }
 0x11e   :  { %v441_v11 = vadd.f32 %v2636_v7, %v3277_v49  ;;  %v432_v12 = vpop.f32.mrb[33].mxu0  ;;  %v765_v13 = vpack.c.bf16 %v716_v9, %v715_v8 }
 0x11f   :  { %v433_v14 = vadd.f32 %v432_v12, %v3277_v49  ;;  %v2637_v15 = vpop.f32.mrb[34].mxu0 }
 0x120   :  { %v657_v16 = vmul.f32 0.01, %v441_v11  ;;  %v444_v17 = vadd.f32 %v2637_v15, %v3277_v49  ;;  %v435_v18 = vpop.f32.mrb[35].mxu0  ;;  %2710 = vmatprep.mubr.bf16.mxu1 %v765_v13  ;;  %vm593_vm1 = vcmp.ge.f32.partialorder %v441_v11, 0.0 }
 0x121   :  { %v655_v19 = vmul.f32 0.01, %v433_v14  ;;  %v436_v20 = vadd.f32 %v435_v18, %v3277_v49  ;;  %2711 = vmatmul.mubr.bf16.gmra.mrb[28].mxu1 %v766_v10  ;;  %vm591_vm2 = vcmp.ge.f32.partialorder %v433_v14, 0.0 }
 0x122   :  { %vm594_vm3 = vcmp.ge.f32.partialorder %v444_v17, 0.0  ;;  %v658_v21 = vmul.f32 0.01, %v444_v17  ;;  %v721_v23 = vsel %vm593_vm1, %v441_v11, %v657_v16 }
 0x123   :  { %vm592_vm4 = vcmp.ge.f32.partialorder %v436_v20, 0.0  ;;  %v656_v22 = vmul.f32 0.01, %v436_v20  ;;  %v719_v26 = vsel %vm591_vm2, %v433_v14, %v655_v19 }
 0x124   :  { %v722_v24 = vsel %vm594_vm3, %v444_v17, %v658_v21 }
 0x125   :  { %v2640_v25 = vpop.f32.mrb[36].mxu0  ;;  %v720_v27 = vsel %vm592_vm4, %v436_v20, %v656_v22  ;;  %v768_v28 = vpack.c.bf16 %v722_v24, %v721_v23 }
 0x126   :  { %v457_v29 = vadd.f32 %v2640_v25, %v3277_v49  ;;  %v448_v30 = vpop.f32.mrb[37].mxu0  ;;  %v767_v31 = vpack.c.bf16 %v720_v27, %v719_v26 }
 0x127   :  { %v449_v32 = vadd.f32 %v448_v30, %v3277_v49  ;;  %v2641_v33 = vpop.f32.mrb[38].mxu0 }
 0x128   :  { %v661_v34 = vmul.f32 0.01, %v457_v29  ;;  %v460_v35 = vadd.f32 %v2641_v33, %v3277_v49  ;;  %v451_v36 = vpop.f32.mrb[39].mxu0  ;;  %2714 = vmatprep.mubr.bf16.mxu1 %v767_v31  ;;  %vm597_vm5 = vcmp.ge.f32.partialorder %v457_v29, 0.0 }
 0x129   :  { %v659_v37 = vmul.f32 0.01, %v449_v32  ;;  %v452_v38 = vadd.f32 %v451_v36, %v3277_v49  ;;  %2715 = vmatmul.mubr.bf16.gmra.mrb[32].mxu1 %v768_v28  ;;  %vm595_vm6 = vcmp.ge.f32.partialorder %v449_v32, 0.0 }
 0x12a   :  { %vm598_vm7 = vcmp.ge.f32.partialorder %v460_v35, 0.0  ;;  %v662_v39 = vmul.f32 0.01, %v460_v35  ;;  %v725_v41 = vsel %vm597_vm5, %v457_v29, %v661_v34 }
 0x12b   :  { %vm596_vm8 = vcmp.ge.f32.partialorder %v452_v38, 0.0  ;;  %v660_v40 = vmul.f32 0.01, %v452_v38  ;;  %v723_v44 = vsel %vm595_vm6, %v449_v32, %v659_v37 }
 0x12c   :  { %v726_v42 = vsel %vm598_vm7, %v460_v35, %v662_v39 }
 0x12d   :  { %v2644_v43 = vpop.f32.mrb[40].mxu0  ;;  %v724_v45 = vsel %vm596_vm8, %v452_v38, %v660_v40  ;;  %v770_v46 = vpack.c.bf16 %v726_v42, %v725_v41 }
 0x12e   :  { %v473_v47 = vadd.f32 %v2644_v43, %v3277_v49  ;;  %v464_v48 = vpop.f32.mrb[41].mxu0  ;;  %v769_v50 = vpack.c.bf16 %v724_v45, %v723_v44 }
 0x12f   :  { %v465_v51 = vadd.f32 %v464_v48, %v3277_v49  ;;  %v2645_v52 = vpop.f32.mrb[42].mxu0 }
 0x130   :  { %v665_v53 = vmul.f32 0.01, %v473_v47  ;;  %v476_v54 = vadd.f32 %v2645_v52, %v3277_v49  ;;  %v467_v55 = vpop.f32.mrb[43].mxu0  ;;  %2718 = vmatprep.mubr.bf16.mxu1 %v769_v50  ;;  %vm601_vm9 = vcmp.ge.f32.partialorder %v473_v47, 0.0 }
 0x131   :  { %v663_v56 = vmul.f32 0.01, %v465_v51  ;;  %v468_v57 = vadd.f32 %v467_v55, %v3277_v49  ;;  %2719 = vmatmul.mubr.bf16.gmra.mrb[36].mxu1 %v770_v46  ;;  %vm599_vm10 = vcmp.ge.f32.partialorder %v465_v51, 0.0 }
 0x132   :  { %vm602_vm11 = vcmp.ge.f32.partialorder %v476_v54, 0.0  ;;  %v666_v58 = vmul.f32 0.01, %v476_v54  ;;  %v729_v60 = vsel %vm601_vm9, %v473_v47, %v665_v53 }
 0x133   :  { %vm600_vm12 = vcmp.ge.f32.partialorder %v468_v57, 0.0  ;;  %v664_v59 = vmul.f32 0.01, %v468_v57  ;;  %v727_v63 = vsel %vm599_vm10, %v465_v51, %v663_v56 }
 0x134   :  { %v730_v61 = vsel %vm602_vm11, %v476_v54, %v666_v58 }
 0x135   :  { %v2648_v62 = vpop.f32.mrb[44].mxu0  ;;  %v728_v0 = vsel %vm600_vm12, %v468_v57, %v664_v59  ;;  %v772_v1 = vpack.c.bf16 %v730_v61, %v729_v60 }
 0x136   :  { %v489_v2 = vadd.f32 %v2648_v62, %v3277_v49  ;;  %v480_v3 = vpop.f32.mrb[45].mxu0  ;;  %v771_v4 = vpack.c.bf16 %v728_v0, %v727_v63 }
 0x137   :  { %v481_v5 = vadd.f32 %v480_v3, %v3277_v49  ;;  %v2649_v6 = vpop.f32.mrb[46].mxu0 }
 0x138   :  { %v669_v7 = vmul.f32 0.01, %v489_v2  ;;  %v492_v8 = vadd.f32 %v2649_v6, %v3277_v49  ;;  %v483_v9 = vpop.f32.mrb[47].mxu0  ;;  %2722 = vmatprep.mubr.bf16.mxu1 %v771_v4  ;;  %vm605_vm13 = vcmp.ge.f32.partialorder %v489_v2, 0.0 }
 0x139   :  { %v667_v10 = vmul.f32 0.01, %v481_v5  ;;  %v484_v11 = vadd.f32 %v483_v9, %v3277_v49  ;;  %2723 = vmatmul.mubr.bf16.gmra.mrb[40].mxu1 %v772_v1  ;;  %vm603_vm14 = vcmp.ge.f32.partialorder %v481_v5, 0.0 }
 0x13a   :  { %vm606_vm15 = vcmp.ge.f32.partialorder %v492_v8, 0.0  ;;  %v670_v12 = vmul.f32 0.01, %v492_v8  ;;  %v733_v14 = vsel %vm605_vm13, %v489_v2, %v669_v7 }
 0x13b   :  { %vm604_vm0 = vcmp.ge.f32.partialorder %v484_v11, 0.0  ;;  %v668_v13 = vmul.f32 0.01, %v484_v11  ;;  %v731_v17 = vsel %vm603_vm14, %v481_v5, %v667_v10 }
 0x13c   :  { %v734_v15 = vsel %vm606_vm15, %v492_v8, %v670_v12 }
 0x13d   :  { %v2652_v16 = vpop.f32.mrb[48].mxu0  ;;  %v732_v18 = vsel %vm604_vm0, %v484_v11, %v668_v13  ;;  %v774_v19 = vpack.c.bf16 %v734_v15, %v733_v14 }
 0x13e   :  { %v505_v20 = vadd.f32 %v2652_v16, %v3277_v49  ;;  %v496_v21 = vpop.f32.mrb[49].mxu0  ;;  %v773_v22 = vpack.c.bf16 %v732_v18, %v731_v17 }
 0x13f   :  { %v497_v23 = vadd.f32 %v496_v21, %v3277_v49  ;;  %v2653_v24 = vpop.f32.mrb[50].mxu0 }
 0x140   :  { %v673_v25 = vmul.f32 0.01, %v505_v20  ;;  %v508_v26 = vadd.f32 %v2653_v24, %v3277_v49  ;;  %v499_v27 = vpop.f32.mrb[51].mxu0  ;;  %2726 = vmatprep.mubr.bf16.mxu1 %v773_v22  ;;  %vm609_vm1 = vcmp.ge.f32.partialorder %v505_v20, 0.0 }
 0x141   :  { %v671_v28 = vmul.f32 0.01, %v497_v23  ;;  %v500_v29 = vadd.f32 %v499_v27, %v3277_v49  ;;  %2727 = vmatmul.mubr.bf16.gmra.mrb[44].mxu1 %v774_v19  ;;  %vm607_vm2 = vcmp.ge.f32.partialorder %v497_v23, 0.0 }
 0x142   :  { %vm610_vm3 = vcmp.ge.f32.partialorder %v508_v26, 0.0  ;;  %v674_v30 = vmul.f32 0.01, %v508_v26  ;;  %v737_v32 = vsel %vm609_vm1, %v505_v20, %v673_v25 }
 0x143   :  { %vm608_vm4 = vcmp.ge.f32.partialorder %v500_v29, 0.0  ;;  %v672_v31 = vmul.f32 0.01, %v500_v29  ;;  %v735_v35 = vsel %vm607_vm2, %v497_v23, %v671_v28 }
 0x144   :  { %v738_v33 = vsel %vm610_vm3, %v508_v26, %v674_v30  ;;  %v3375_v30 = vld [vmem:[%s3894_s9 + $0x8] sm:$0xff]  }
 0x145   :  { %v2656_v34 = vpop.f32.mrb[52].mxu0  ;;  %v736_v36 = vsel %vm608_vm4, %v500_v29, %v672_v31  ;;  %v776_v37 = vpack.c.bf16 %v738_v33, %v737_v32  ;;  %v2940_v29 = vld [vmem:[%s3894_s9] sm:$0xff]  }
 0x146   :  { %v521_v38 = vadd.f32 %v2656_v34, %v3277_v49  ;;  %v512_v39 = vpop.f32.mrb[53].mxu0  ;;  %v775_v40 = vpack.c.bf16 %v736_v36, %v735_v35  ;;  %2906 = vmatprep.subr.bf16.mxu1 %v2940_v29  ;;  %2826 = vmatprep.subr.bf16.mxu0 %v2940_v29 }
 0x147   :  { %v513_v41 = vadd.f32 %v512_v39, %v3277_v49  ;;  %v2657_v42 = vpop.f32.mrb[54].mxu0  ;;  %2914 = vmatpush3.bf16.msra.mxu1 %v2940_v29 }
 0x148   :  { %v677_v43 = vmul.f32 0.01, %v521_v38  ;;  %v524_v44 = vadd.f32 %v2657_v42, %v3277_v49  ;;  %v515_v45 = vpop.f32.mrb[55].mxu0  ;;  %2730 = vmatprep.mubr.bf16.mxu1 %v775_v40  ;;  %vm613_vm5 = vcmp.ge.f32.partialorder %v521_v38, 0.0  ;;  %2907 = vmatprep.subr.bf16.mxu1 %v3375_v30 }
 0x149   :  { %v675_v46 = vmul.f32 0.01, %v513_v41  ;;  %v516_v47 = vadd.f32 %v515_v45, %v3277_v49  ;;  %2731 = vmatmul.mubr.bf16.gmra.mrb[48].mxu1 %v776_v37  ;;  %vm611_vm6 = vcmp.ge.f32.partialorder %v513_v41, 0.0 }
 0x14a   :  { %vm614_vm7 = vcmp.ge.f32.partialorder %v524_v44, 0.0  ;;  %v678_v48 = vmul.f32 0.01, %v524_v44  ;;  %v741_v51 = vsel %vm613_vm5, %v521_v38, %v677_v43 }
 0x14b   :  { %vm612_vm8 = vcmp.ge.f32.partialorder %v516_v47, 0.0  ;;  %v676_v50 = vmul.f32 0.01, %v516_v47  ;;  %v739_v54 = vsel %vm611_vm6, %v513_v41, %v675_v46  ;;  %2915 = vmatpush3.bf16.msra.mxu1 %v3375_v30  ;;  %v3386_v41 = vld [vmem:[%s3894_s9 + $0x10] sm:$0xff]  }
 0x14c   :  { %v742_v52 = vsel %vm614_vm7, %v524_v44, %v678_v48  ;;  %2908 = vmatprep.subr.bf16.mxu1 %v3386_v41  ;;  %v3392_v44 = vld [vmem:[%s3894_s9 + $0x18] sm:$0xff]  }
 0x14d   :  { %v2660_v53 = vpop.f32.mrb[56].mxu0  ;;  %v740_v55 = vsel %vm612_vm8, %v516_v47, %v676_v50  ;;  %v778_v56 = vpack.c.bf16 %v742_v52, %v741_v51 }
 0x14e   :  { %v537_v57 = vadd.f32 %v2660_v53, %v3277_v49  ;;  %v528_v58 = vpop.f32.mrb[57].mxu0  ;;  %v777_v59 = vpack.c.bf16 %v740_v55, %v739_v54 }
 0x14f   :  { %v529_v60 = vadd.f32 %v528_v58, %v3277_v49  ;;  %v2661_v61 = vpop.f32.mrb[58].mxu0  ;;  %2916 = vmatpush3.bf16.msra.mxu1 %v3386_v41 }
 0x150   :  { %v681_v62 = vmul.f32 0.01, %v537_v57  ;;  %v540_v63 = vadd.f32 %v2661_v61, %v3277_v49  ;;  %v531_v0 = vpop.f32.mrb[59].mxu0  ;;  %2734 = vmatprep.mubr.bf16.mxu1 %v777_v59  ;;  %vm617_vm9 = vcmp.ge.f32.partialorder %v537_v57, 0.0  ;;  %2909 = vmatprep.subr.bf16.mxu1 %v3392_v44 }
 0x151   :  { %v679_v1 = vmul.f32 0.01, %v529_v60  ;;  %v532_v2 = vadd.f32 %v531_v0, %v3277_v49  ;;  %2735 = vmatmul.mubr.bf16.gmra.mrb[52].mxu1 %v778_v56  ;;  %vm615_vm10 = vcmp.ge.f32.partialorder %v529_v60, 0.0 }
 0x152   :  { %vm618_vm11 = vcmp.ge.f32.partialorder %v540_v63, 0.0  ;;  %v682_v3 = vmul.f32 0.01, %v540_v63  ;;  %v745_v5 = vsel %vm617_vm9, %v537_v57, %v681_v62  ;;  %v3401_v57 = vld [vmem:[%s3894_s9 + $0x20] sm:$0xff]  }
 0x153   :  { %vm616_vm12 = vcmp.ge.f32.partialorder %v532_v2, 0.0  ;;  %v680_v4 = vmul.f32 0.01, %v532_v2  ;;  %v743_v8 = vsel %vm615_vm10, %v529_v60, %v679_v1  ;;  %2917 = vmatpush3.bf16.msra.mxu1 %v3392_v44  ;;  %v3410_v1 = vld [vmem:[%s3894_s9 + $0x28] sm:$0xff]  }
 0x154   :  { %v746_v6 = vsel %vm618_vm11, %v540_v63, %v682_v3  ;;  %2910 = vmatprep.subr.bf16.mxu1 %v3401_v57 }
 0x155   :  { %v2664_v7 = vpop.f32.mrb[60].mxu0  ;;  %v744_v9 = vsel %vm616_vm12, %v532_v2, %v680_v4  ;;  %v780_v10 = vpack.c.bf16 %v746_v6, %v745_v5 }
 0x156   :  { %v553_v11 = vadd.f32 %v2664_v7, %v3277_v49  ;;  %v544_v12 = vpop.f32.mrb[61].mxu0  ;;  %v779_v13 = vpack.c.bf16 %v744_v9, %v743_v8 }
 0x157   :  { %v545_v14 = vadd.f32 %v544_v12, %v3277_v49  ;;  %v2665_v15 = vpop.f32.mrb[62].mxu0  ;;  %2918 = vmatpush3.bf16.msra.mxu1 %v3401_v57 }
 0x158   :  { %v685_v16 = vmul.f32 0.01, %v553_v11  ;;  %v556_v17 = vadd.f32 %v2665_v15, %v3277_v49  ;;  %v547_v18 = vpop.f32.mrb[63].mxu0  ;;  %2738 = vmatprep.mubr.bf16.mxu1 %v779_v13  ;;  %vm621_vm13 = vcmp.ge.f32.partialorder %v553_v11, 0.0  ;;  %2911 = vmatprep.subr.bf16.mxu1 %v3410_v1  ;;  %v3421_v13 = vld [vmem:[%s3894_s9 + $0x30] sm:$0xff]  }
 0x159   :  { %v683_v19 = vmul.f32 0.01, %v545_v14  ;;  %v548_v20 = vadd.f32 %v547_v18, %v3277_v49  ;;  %2739 = vmatmul.mubr.bf16.gmra.mrb[56].mxu1 %v780_v10  ;;  %vm619_vm14 = vcmp.ge.f32.partialorder %v545_v14, 0.0  ;;  %v3370_v49 = vld [vmem:[%s3895_s6] ss:$0 sm:$0xff] }
 0x15a   :  { %vm622_vm15 = vcmp.ge.f32.partialorder %v556_v17, 0.0  ;;  %v686_v21 = vmul.f32 0.01, %v556_v17  ;;  %v749_v23 = vsel %vm621_vm13, %v553_v11, %v685_v16 }
 0x15b   :  { %vm620_vm0 = vcmp.ge.f32.partialorder %v548_v20, 0.0  ;;  %v684_v22 = vmul.f32 0.01, %v548_v20  ;;  %v747_v25 = vsel %vm619_vm14, %v545_v14, %v683_v19  ;;  %2919 = vmatpush3.bf16.msra.mxu1 %v3410_v1 }
 0x15c   :  { %v750_v24 = vsel %vm622_vm15, %v556_v17, %v686_v21  ;;  %2912 = vmatprep.subr.bf16.mxu1 %v3421_v13 }
 0x15d   :  { %v748_v26 = vsel %vm620_vm0, %v548_v20, %v684_v22  ;;  %v782_v27 = vpack.c.bf16 %v750_v24, %v749_v23 }
 0x15e   :  { %v781_v28 = vpack.c.bf16 %v748_v26, %v747_v25 }
 0x15f   :  { %2920 = vmatpush3.bf16.msra.mxu1 %v3421_v13 }
 0x160   :  { %2742 = vmatprep.mubr.bf16.mxu1 %v781_v28 }
 0x161   :  { %2743 = vmatmul.mubr.bf16.gmra.mrb[60].mxu1 %v782_v27 }
 0x1bc   :  { %v2684_v31 = vpop.f32.mrb[0].mxu1 }
 0x1bd   :  { %v897_v32 = vadd.f32 %v2684_v31, %v3370_v49  ;;  %v888_v33 = vpop.f32.mrb[1].mxu1 }
 0x1be   :  { %v889_v34 = vadd.f32 %v3370_v49, %v888_v33  ;;  %v2685_v35 = vpop.f32.mrb[2].mxu1 }
 0x1bf   :  { %v1209_v36 = vmul.f32 0.01, %v897_v32  ;;  %v900_v37 = vadd.f32 %v2685_v35, %v3370_v49  ;;  %v891_v38 = vpop.f32.mrb[3].mxu1  ;;  %vm1145_vm1 = vcmp.ge.f32.partialorder %v897_v32, 0.0 }
 0x1c0   :  { %v1207_v39 = vmul.f32 0.01, %v889_v34  ;;  %v892_v40 = vadd.f32 %v3370_v49, %v891_v38  ;;  %vm1143_vm2 = vcmp.ge.f32.partialorder %v889_v34, 0.0 }
 0x1c1   :  { %vm1146_vm3 = vcmp.ge.f32.partialorder %v900_v37, 0.0  ;;  %v1210_v42 = vmul.f32 0.01, %v900_v37  ;;  %v1273_v45 = vsel %vm1145_vm1, %v897_v32, %v1209_v36 }
 0x1c2   :  { %vm1144_vm4 = vcmp.ge.f32.partialorder %v892_v40, 0.0  ;;  %v1208_v43 = vmul.f32 0.01, %v892_v40  ;;  %v1271_v50 = vsel %vm1143_vm2, %v889_v34, %v1207_v39 }
 0x1c3   :  { %v1274_v46 = vsel %vm1146_vm3, %v900_v37, %v1210_v42 }
 0x1c4   :  { %v1336_v47 = vpack.c.bf16 %v1274_v46, %v1273_v45  ;;  %v2688_v48 = vpop.f32.mrb[4].mxu1  ;;  %v1272_v51 = vsel %vm1144_vm4, %v892_v40, %v1208_v43 }
 0x1c5   :  { %v913_v52 = vadd.f32 %v2688_v48, %v3370_v49  ;;  %v904_v53 = vpop.f32.mrb[5].mxu1  ;;  %v1335_v54 = vpack.c.bf16 %v1272_v51, %v1271_v50 }
 0x1c6   :  { %v905_v55 = vadd.f32 %v3370_v49, %v904_v53  ;;  %v2689_v56 = vpop.f32.mrb[6].mxu1 }
 0x1c7   :  { %v1213_v58 = vmul.f32 0.01, %v913_v52  ;;  %v916_v59 = vadd.f32 %v2689_v56, %v3370_v49  ;;  %v907_v60 = vpop.f32.mrb[7].mxu1  ;;  %2762 = vmatprep.mubr.bf16.mxu0 %v1335_v54  ;;  %vm1149_vm5 = vcmp.ge.f32.partialorder %v913_v52, 0.0 }
 0x1c8   :  { %v1211_v61 = vmul.f32 0.01, %v905_v55  ;;  %v908_v62 = vadd.f32 %v3370_v49, %v907_v60  ;;  %2763 = vmatmul.mubr.bf16.vlgmr.msra.gmra.mrb[64].mxu0 %v1336_v47  ;;  %vm1147_vm6 = vcmp.ge.f32.partialorder %v905_v55, 0.0 }
 0x1c9   :  { %vm1150_vm7 = vcmp.ge.f32.partialorder %v916_v59, 0.0  ;;  %v1214_v63 = vmul.f32 0.01, %v916_v59  ;;  %2827 = vmatpush3.bf16.msra.mxu0 %v2940_v29  ;;  %v1277_v2 = vsel %vm1149_vm5, %v913_v52, %v1213_v58 }
 0x1ca   :  { %vm1148_vm8 = vcmp.ge.f32.partialorder %v908_v62, 0.0  ;;  %v1212_v0 = vmul.f32 0.01, %v908_v62  ;;  %2828 = vmatprep.subr.bf16.mxu0 %v3375_v30  ;;  %v1275_v5 = vsel %vm1147_vm6, %v905_v55, %v1211_v61 }
 0x1cb   :  { %v1278_v3 = vsel %vm1150_vm7, %v916_v59, %v1214_v63 }
 0x1cc   :  { %v2692_v4 = vpop.f32.mrb[8].mxu1  ;;  %v1276_v6 = vsel %vm1148_vm8, %v908_v62, %v1212_v0  ;;  %v1338_v7 = vpack.c.bf16 %v1278_v3, %v1277_v2 }
 0x1cd   :  { %v929_v8 = vadd.f32 %v2692_v4, %v3370_v49  ;;  %v920_v9 = vpop.f32.mrb[9].mxu1  ;;  %v1337_v10 = vpack.c.bf16 %v1276_v6, %v1275_v5  ;;  %2829 = vmatpush3.bf16.msra.mxu0 %v3375_v30 }
 0x1ce   :  { %v921_v11 = vadd.f32 %v3370_v49, %v920_v9  ;;  %v2693_v12 = vpop.f32.mrb[10].mxu1  ;;  %2830 = vmatprep.subr.bf16.mxu0 %v3386_v41 }
 0x1cf   :  { %v1217_v14 = vmul.f32 0.01, %v929_v8  ;;  %v932_v15 = vadd.f32 %v2693_v12, %v3370_v49  ;;  %v923_v16 = vpop.f32.mrb[11].mxu1  ;;  %2766 = vmatprep.mubr.bf16.mxu0 %v1337_v10  ;;  %vm1153_vm9 = vcmp.ge.f32.partialorder %v929_v8, 0.0 }
 0x1d0   :  { %v1215_v17 = vmul.f32 0.01, %v921_v11  ;;  %v924_v18 = vadd.f32 %v3370_v49, %v923_v16  ;;  %2767 = vmatmul.mubr.bf16.gmra.mrb[68].mxu0 %v1338_v7  ;;  %vm1151_vm10 = vcmp.ge.f32.partialorder %v921_v11, 0.0 }
 0x1d1   :  { %vm1154_vm11 = vcmp.ge.f32.partialorder %v932_v15, 0.0  ;;  %v1218_v19 = vmul.f32 0.01, %v932_v15  ;;  %2831 = vmatpush3.bf16.msra.mxu0 %v3386_v41  ;;  %v1281_v21 = vsel %vm1153_vm9, %v929_v8, %v1217_v14 }
 0x1d2   :  { %vm1152_vm12 = vcmp.ge.f32.partialorder %v924_v18, 0.0  ;;  %v1216_v20 = vmul.f32 0.01, %v924_v18  ;;  %2832 = vmatprep.subr.bf16.mxu0 %v3392_v44  ;;  %v1279_v24 = vsel %vm1151_vm10, %v921_v11, %v1215_v17 }
 0x1d3   :  { %v1282_v22 = vsel %vm1154_vm11, %v932_v15, %v1218_v19 }
 0x1d4   :  { %v2696_v23 = vpop.f32.mrb[12].mxu1  ;;  %v1280_v25 = vsel %vm1152_vm12, %v924_v18, %v1216_v20  ;;  %v1340_v26 = vpack.c.bf16 %v1282_v22, %v1281_v21 }
 0x1d5   :  { %v945_v27 = vadd.f32 %v2696_v23, %v3370_v49  ;;  %v936_v28 = vpop.f32.mrb[13].mxu1  ;;  %v1339_v29 = vpack.c.bf16 %v1280_v25, %v1279_v24  ;;  %2833 = vmatpush3.bf16.msra.mxu0 %v3392_v44 }
 0x1d6   :  { %v937_v30 = vadd.f32 %v3370_v49, %v936_v28  ;;  %v2697_v31 = vpop.f32.mrb[14].mxu1  ;;  %2834 = vmatprep.subr.bf16.mxu0 %v3401_v57 }
 0x1d7   :  { %v1221_v32 = vmul.f32 0.01, %v945_v27  ;;  %v948_v33 = vadd.f32 %v2697_v31, %v3370_v49  ;;  %v939_v34 = vpop.f32.mrb[15].mxu1  ;;  %2770 = vmatprep.mubr.bf16.mxu0 %v1339_v29  ;;  %vm1157_vm13 = vcmp.ge.f32.partialorder %v945_v27, 0.0 }
 0x1d8   :  { %v1219_v35 = vmul.f32 0.01, %v937_v30  ;;  %v940_v36 = vadd.f32 %v3370_v49, %v939_v34  ;;  %2771 = vmatmul.mubr.bf16.gmra.mrb[72].mxu0 %v1340_v26  ;;  %vm1155_vm14 = vcmp.ge.f32.partialorder %v937_v30, 0.0 }
 0x1d9   :  { %vm1158_vm15 = vcmp.ge.f32.partialorder %v948_v33, 0.0  ;;  %v1222_v37 = vmul.f32 0.01, %v948_v33  ;;  %2835 = vmatpush3.bf16.msra.mxu0 %v3401_v57  ;;  %v1285_v39 = vsel %vm1157_vm13, %v945_v27, %v1221_v32 }
 0x1da   :  { %vm1156_vm0 = vcmp.ge.f32.partialorder %v940_v36, 0.0  ;;  %v1220_v38 = vmul.f32 0.01, %v940_v36  ;;  %2836 = vmatprep.subr.bf16.mxu0 %v3410_v1  ;;  %v1283_v42 = vsel %vm1155_vm14, %v937_v30, %v1219_v35 }
 0x1db   :  { %v1286_v40 = vsel %vm1158_vm15, %v948_v33, %v1222_v37 }
 0x1dc   :  { %v2700_v41 = vpop.f32.mrb[16].mxu1  ;;  %v1284_v43 = vsel %vm1156_vm0, %v940_v36, %v1220_v38  ;;  %v1342_v44 = vpack.c.bf16 %v1286_v40, %v1285_v39 }
 0x1dd   :  { %v961_v45 = vadd.f32 %v2700_v41, %v3370_v49  ;;  %v952_v46 = vpop.f32.mrb[17].mxu1  ;;  %v1341_v47 = vpack.c.bf16 %v1284_v43, %v1283_v42  ;;  %2837 = vmatpush3.bf16.msra.mxu0 %v3410_v1 }
 0x1de   :  { %v953_v48 = vadd.f32 %v3370_v49, %v952_v46  ;;  %v2701_v50 = vpop.f32.mrb[18].mxu1  ;;  %2838 = vmatprep.subr.bf16.mxu0 %v3421_v13 }
 0x1df   :  { %v1225_v51 = vmul.f32 0.01, %v961_v45  ;;  %v964_v52 = vadd.f32 %v2701_v50, %v3370_v49  ;;  %v955_v53 = vpop.f32.mrb[19].mxu1  ;;  %2774 = vmatprep.mubr.bf16.mxu0 %v1341_v47  ;;  %vm1161_vm1 = vcmp.ge.f32.partialorder %v961_v45, 0.0 }
 0x1e0   :  { %v1223_v54 = vmul.f32 0.01, %v953_v48  ;;  %v956_v55 = vadd.f32 %v3370_v49, %v955_v53  ;;  %2775 = vmatmul.mubr.bf16.gmra.mrb[76].mxu0 %v1342_v44  ;;  %vm1159_vm2 = vcmp.ge.f32.partialorder %v953_v48, 0.0 }
 0x1e1   :  { %vm1162_vm3 = vcmp.ge.f32.partialorder %v964_v52, 0.0  ;;  %v1226_v56 = vmul.f32 0.01, %v964_v52  ;;  %2839 = vmatpush3.bf16.msra.mxu0 %v3421_v13  ;;  %v1289_v58 = vsel %vm1161_vm1, %v961_v45, %v1225_v51 }
 0x1e2   :  { %vm1160_vm4 = vcmp.ge.f32.partialorder %v956_v55, 0.0  ;;  %v1224_v57 = vmul.f32 0.01, %v956_v55  ;;  %v1287_v61 = vsel %vm1159_vm2, %v953_v48, %v1223_v54 }
 0x1e3   :  { %v1290_v59 = vsel %vm1162_vm3, %v964_v52, %v1226_v56 }
 0x1e4   :  { %v2704_v60 = vpop.f32.mrb[20].mxu1  ;;  %v1288_v62 = vsel %vm1160_vm4, %v956_v55, %v1224_v57  ;;  %v1344_v63 = vpack.c.bf16 %v1290_v59, %v1289_v58 }
 0x1e5   :  { %v977_v0 = vadd.f32 %v2704_v60, %v3370_v49  ;;  %v968_v1 = vpop.f32.mrb[21].mxu1  ;;  %v1343_v2 = vpack.c.bf16 %v1288_v62, %v1287_v61 }
 0x1e6   :  { %v969_v3 = vadd.f32 %v3370_v49, %v968_v1  ;;  %v2705_v4 = vpop.f32.mrb[22].mxu1 }
 0x1e7   :  { %v1229_v5 = vmul.f32 0.01, %v977_v0  ;;  %v980_v6 = vadd.f32 %v2705_v4, %v3370_v49  ;;  %v971_v7 = vpop.f32.mrb[23].mxu1  ;;  %2778 = vmatprep.mubr.bf16.mxu0 %v1343_v2  ;;  %vm1165_vm5 = vcmp.ge.f32.partialorder %v977_v0, 0.0 }
 0x1e8   :  { %v1227_v8 = vmul.f32 0.01, %v969_v3  ;;  %v972_v9 = vadd.f32 %v3370_v49, %v971_v7  ;;  %2779 = vmatmul.mubr.bf16.gmra.mrb[80].mxu0 %v1344_v63  ;;  %vm1163_vm6 = vcmp.ge.f32.partialorder %v969_v3, 0.0 }
 0x1e9   :  { %vm1166_vm7 = vcmp.ge.f32.partialorder %v980_v6, 0.0  ;;  %v1230_v10 = vmul.f32 0.01, %v980_v6  ;;  %v1293_v12 = vsel %vm1165_vm5, %v977_v0, %v1229_v5 }
 0x1ea   :  { %vm1164_vm8 = vcmp.ge.f32.partialorder %v972_v9, 0.0  ;;  %v1228_v11 = vmul.f32 0.01, %v972_v9  ;;  %v1291_v15 = vsel %vm1163_vm6, %v969_v3, %v1227_v8 }
 0x1eb   :  { %v1294_v13 = vsel %vm1166_vm7, %v980_v6, %v1230_v10 }
 0x1ec   :  { %v2708_v14 = vpop.f32.mrb[24].mxu1  ;;  %v1292_v16 = vsel %vm1164_vm8, %v972_v9, %v1228_v11  ;;  %v1346_v17 = vpack.c.bf16 %v1294_v13, %v1293_v12 }
 0x1ed   :  { %v993_v18 = vadd.f32 %v2708_v14, %v3370_v49  ;;  %v984_v19 = vpop.f32.mrb[25].mxu1  ;;  %v1345_v20 = vpack.c.bf16 %v1292_v16, %v1291_v15 }
 0x1ee   :  { %v985_v21 = vadd.f32 %v3370_v49, %v984_v19  ;;  %v2709_v22 = vpop.f32.mrb[26].mxu1 }
 0x1ef   :  { %v1233_v23 = vmul.f32 0.01, %v993_v18  ;;  %v996_v24 = vadd.f32 %v2709_v22, %v3370_v49  ;;  %v987_v25 = vpop.f32.mrb[27].mxu1  ;;  %2782 = vmatprep.mubr.bf16.mxu0 %v1345_v20  ;;  %vm1169_vm9 = vcmp.ge.f32.partialorder %v993_v18, 0.0 }
 0x1f0   :  { %v1231_v26 = vmul.f32 0.01, %v985_v21  ;;  %v988_v27 = vadd.f32 %v3370_v49, %v987_v25  ;;  %2783 = vmatmul.mubr.bf16.gmra.mrb[84].mxu0 %v1346_v17  ;;  %vm1167_vm10 = vcmp.ge.f32.partialorder %v985_v21, 0.0 }
 0x1f1   :  { %vm1170_vm11 = vcmp.ge.f32.partialorder %v996_v24, 0.0  ;;  %v1234_v28 = vmul.f32 0.01, %v996_v24  ;;  %v1297_v30 = vsel %vm1169_vm9, %v993_v18, %v1233_v23 }
 0x1f2   :  { %vm1168_vm12 = vcmp.ge.f32.partialorder %v988_v27, 0.0  ;;  %v1232_v29 = vmul.f32 0.01, %v988_v27  ;;  %v1295_v33 = vsel %vm1167_vm10, %v985_v21, %v1231_v26 }
 0x1f3   :  { %v1298_v31 = vsel %vm1170_vm11, %v996_v24, %v1234_v28 }
 0x1f4   :  { %v2712_v32 = vpop.f32.mrb[28].mxu1  ;;  %v1296_v34 = vsel %vm1168_vm12, %v988_v27, %v1232_v29  ;;  %v1348_v35 = vpack.c.bf16 %v1298_v31, %v1297_v30 }
 0x1f5   :  { %v1009_v36 = vadd.f32 %v2712_v32, %v3370_v49  ;;  %v1000_v37 = vpop.f32.mrb[29].mxu1  ;;  %v1347_v38 = vpack.c.bf16 %v1296_v34, %v1295_v33 }
 0x1f6   :  { %v1001_v39 = vadd.f32 %v3370_v49, %v1000_v37  ;;  %v2713_v40 = vpop.f32.mrb[30].mxu1 }
 0x1f7   :  { %v1237_v41 = vmul.f32 0.01, %v1009_v36  ;;  %v1012_v42 = vadd.f32 %v2713_v40, %v3370_v49  ;;  %v1003_v43 = vpop.f32.mrb[31].mxu1  ;;  %2786 = vmatprep.mubr.bf16.mxu0 %v1347_v38  ;;  %vm1173_vm13 = vcmp.ge.f32.partialorder %v1009_v36, 0.0 }
 0x1f8   :  { %v1235_v44 = vmul.f32 0.01, %v1001_v39  ;;  %v1004_v45 = vadd.f32 %v3370_v49, %v1003_v43  ;;  %2787 = vmatmul.mubr.bf16.gmra.mrb[88].mxu0 %v1348_v35  ;;  %vm1171_vm14 = vcmp.ge.f32.partialorder %v1001_v39, 0.0 }
 0x1f9   :  { %vm1174_vm15 = vcmp.ge.f32.partialorder %v1012_v42, 0.0  ;;  %v1238_v46 = vmul.f32 0.01, %v1012_v42  ;;  %v1301_v48 = vsel %vm1173_vm13, %v1009_v36, %v1237_v41 }
 0x1fa   :  { %vm1172_vm0 = vcmp.ge.f32.partialorder %v1004_v45, 0.0  ;;  %v1236_v47 = vmul.f32 0.01, %v1004_v45  ;;  %v1299_v52 = vsel %vm1171_vm14, %v1001_v39, %v1235_v44 }
 0x1fb   :  { %v1302_v50 = vsel %vm1174_vm15, %v1012_v42, %v1238_v46 }
 0x1fc   :  { %v2716_v51 = vpop.f32.mrb[32].mxu1  ;;  %v1300_v53 = vsel %vm1172_vm0, %v1004_v45, %v1236_v47  ;;  %v1350_v54 = vpack.c.bf16 %v1302_v50, %v1301_v48 }
 0x1fd   :  { %v1025_v55 = vadd.f32 %v2716_v51, %v3370_v49  ;;  %v1016_v56 = vpop.f32.mrb[33].mxu1  ;;  %v1349_v57 = vpack.c.bf16 %v1300_v53, %v1299_v52 }
 0x1fe   :  { %v1017_v58 = vadd.f32 %v3370_v49, %v1016_v56  ;;  %v2717_v59 = vpop.f32.mrb[34].mxu1 }
 0x1ff   :  { %v1241_v60 = vmul.f32 0.01, %v1025_v55  ;;  %v1028_v61 = vadd.f32 %v2717_v59, %v3370_v49  ;;  %v1019_v62 = vpop.f32.mrb[35].mxu1  ;;  %2790 = vmatprep.mubr.bf16.mxu0 %v1349_v57  ;;  %vm1177_vm1 = vcmp.ge.f32.partialorder %v1025_v55, 0.0 }
 0x200   :  { %v1239_v63 = vmul.f32 0.01, %v1017_v58  ;;  %v1020_v0 = vadd.f32 %v3370_v49, %v1019_v62  ;;  %2791 = vmatmul.mubr.bf16.gmra.mrb[92].mxu0 %v1350_v54  ;;  %vm1175_vm2 = vcmp.ge.f32.partialorder %v1017_v58, 0.0 }
 0x201   :  { %vm1178_vm3 = vcmp.ge.f32.partialorder %v1028_v61, 0.0  ;;  %v1242_v1 = vmul.f32 0.01, %v1028_v61  ;;  %v1305_v3 = vsel %vm1177_vm1, %v1025_v55, %v1241_v60 }
 0x202   :  { %vm1176_vm4 = vcmp.ge.f32.partialorder %v1020_v0, 0.0  ;;  %v1240_v2 = vmul.f32 0.01, %v1020_v0  ;;  %v1303_v6 = vsel %vm1175_vm2, %v1017_v58, %v1239_v63 }
 0x203   :  { %v1306_v4 = vsel %vm1178_vm3, %v1028_v61, %v1242_v1 }
 0x204   :  { %v2720_v5 = vpop.f32.mrb[36].mxu1  ;;  %v1304_v7 = vsel %vm1176_vm4, %v1020_v0, %v1240_v2  ;;  %v1352_v8 = vpack.c.bf16 %v1306_v4, %v1305_v3 }
 0x205   :  { %v1041_v9 = vadd.f32 %v2720_v5, %v3370_v49  ;;  %v1032_v10 = vpop.f32.mrb[37].mxu1  ;;  %v1351_v11 = vpack.c.bf16 %v1304_v7, %v1303_v6 }
 0x206   :  { %v1033_v12 = vadd.f32 %v3370_v49, %v1032_v10  ;;  %v2721_v13 = vpop.f32.mrb[38].mxu1 }
 0x207   :  { %v1245_v14 = vmul.f32 0.01, %v1041_v9  ;;  %v1044_v15 = vadd.f32 %v2721_v13, %v3370_v49  ;;  %v1035_v16 = vpop.f32.mrb[39].mxu1  ;;  %2794 = vmatprep.mubr.bf16.mxu0 %v1351_v11  ;;  %vm1181_vm5 = vcmp.ge.f32.partialorder %v1041_v9, 0.0  ;;  %v2947_v11 = vld [vmem:[%s3894_s9 + $0x38] sm:$0xff]  }
 0x208   :  { %v1243_v17 = vmul.f32 0.01, %v1033_v12  ;;  %v1036_v18 = vadd.f32 %v3370_v49, %v1035_v16  ;;  %2795 = vmatmul.mubr.bf16.gmra.mrb[96].mxu0 %v1352_v8  ;;  %vm1179_vm6 = vcmp.ge.f32.partialorder %v1033_v12, 0.0  ;;  %2913 = vmatprep.subr.bf16.mxu1 %v2947_v11 }
 0x209   :  { %vm1182_vm7 = vcmp.ge.f32.partialorder %v1044_v15, 0.0  ;;  %v1246_v19 = vmul.f32 0.01, %v1044_v15  ;;  %v1309_v21 = vsel %vm1181_vm5, %v1041_v9, %v1245_v14  ;;  %2840 = vmatprep.subr.bf16.mxu0 %v2947_v11  ;;  %2921 = vmatpush3.bf16.msra.mxu1 %v2947_v11 }
 0x20a   :  { %vm1180_vm8 = vcmp.ge.f32.partialorder %v1036_v18, 0.0  ;;  %v1244_v20 = vmul.f32 0.01, %v1036_v18  ;;  %v1307_v24 = vsel %vm1179_vm6, %v1033_v12, %v1243_v17  ;;  %2841 = vmatpush3.bf16.msra.mxu0 %v2947_v11 }
 0x20b   :  { %v1310_v22 = vsel %vm1182_vm7, %v1044_v15, %v1246_v19 }
 0x20c   :  { %v2724_v23 = vpop.f32.mrb[40].mxu1  ;;  %v1308_v25 = vsel %vm1180_vm8, %v1036_v18, %v1244_v20  ;;  %v1354_v26 = vpack.c.bf16 %v1310_v22, %v1309_v21 }
 0x20d   :  { %v1057_v27 = vadd.f32 %v2724_v23, %v3370_v49  ;;  %v1048_v28 = vpop.f32.mrb[41].mxu1  ;;  %v1353_v29 = vpack.c.bf16 %v1308_v25, %v1307_v24 }
 0x20e   :  { %v1049_v30 = vadd.f32 %v3370_v49, %v1048_v28  ;;  %v2725_v31 = vpop.f32.mrb[42].mxu1 }
 0x20f   :  { %v1249_v32 = vmul.f32 0.01, %v1057_v27  ;;  %v1060_v33 = vadd.f32 %v2725_v31, %v3370_v49  ;;  %v1051_v34 = vpop.f32.mrb[43].mxu1  ;;  %2798 = vmatprep.mubr.bf16.mxu0 %v1353_v29  ;;  %vm1185_vm9 = vcmp.ge.f32.partialorder %v1057_v27, 0.0 }
 0x210   :  { %v1247_v35 = vmul.f32 0.01, %v1049_v30  ;;  %v1052_v36 = vadd.f32 %v3370_v49, %v1051_v34  ;;  %2799 = vmatmul.mubr.bf16.gmra.mrb[100].mxu0 %v1354_v26  ;;  %vm1183_vm10 = vcmp.ge.f32.partialorder %v1049_v30, 0.0 }
 0x211   :  { %vm1186_vm11 = vcmp.ge.f32.partialorder %v1060_v33, 0.0  ;;  %v1250_v37 = vmul.f32 0.01, %v1060_v33  ;;  %v1313_v39 = vsel %vm1185_vm9, %v1057_v27, %v1249_v32 }
 0x212   :  { %vm1184_vm12 = vcmp.ge.f32.partialorder %v1052_v36, 0.0  ;;  %v1248_v38 = vmul.f32 0.01, %v1052_v36  ;;  %v1311_v42 = vsel %vm1183_vm10, %v1049_v30, %v1247_v35 }
 0x213   :  { %v1314_v40 = vsel %vm1186_vm11, %v1060_v33, %v1250_v37 }
 0x214   :  { %v2728_v41 = vpop.f32.mrb[44].mxu1  ;;  %v1312_v43 = vsel %vm1184_vm12, %v1052_v36, %v1248_v38  ;;  %v1356_v44 = vpack.c.bf16 %v1314_v40, %v1313_v39 }
 0x215   :  { %v1073_v45 = vadd.f32 %v2728_v41, %v3370_v49  ;;  %v1064_v46 = vpop.f32.mrb[45].mxu1  ;;  %v1355_v47 = vpack.c.bf16 %v1312_v43, %v1311_v42 }
 0x216   :  { %v1065_v48 = vadd.f32 %v3370_v49, %v1064_v46  ;;  %v2729_v50 = vpop.f32.mrb[46].mxu1 }
 0x217   :  { %v1253_v51 = vmul.f32 0.01, %v1073_v45  ;;  %v1076_v52 = vadd.f32 %v2729_v50, %v3370_v49  ;;  %v1067_v53 = vpop.f32.mrb[47].mxu1  ;;  %2802 = vmatprep.mubr.bf16.mxu0 %v1355_v47  ;;  %vm1189_vm13 = vcmp.ge.f32.partialorder %v1073_v45, 0.0 }
 0x218   :  { %v1251_v54 = vmul.f32 0.01, %v1065_v48  ;;  %v1068_v55 = vadd.f32 %v3370_v49, %v1067_v53  ;;  %2803 = vmatmul.mubr.bf16.gmra.mrb[104].mxu0 %v1356_v44  ;;  %vm1187_vm14 = vcmp.ge.f32.partialorder %v1065_v48, 0.0 }
 0x219   :  { %vm1190_vm15 = vcmp.ge.f32.partialorder %v1076_v52, 0.0  ;;  %v1254_v56 = vmul.f32 0.01, %v1076_v52  ;;  %v1317_v58 = vsel %vm1189_vm13, %v1073_v45, %v1253_v51 }
 0x21a   :  { %vm1188_vm0 = vcmp.ge.f32.partialorder %v1068_v55, 0.0  ;;  %v1252_v57 = vmul.f32 0.01, %v1068_v55  ;;  %v1315_v61 = vsel %vm1187_vm14, %v1065_v48, %v1251_v54 }
 0x21b   :  { %v1318_v59 = vsel %vm1190_vm15, %v1076_v52, %v1254_v56 }
 0x21c   :  { %v2732_v60 = vpop.f32.mrb[48].mxu1  ;;  %v1316_v62 = vsel %vm1188_vm0, %v1068_v55, %v1252_v57  ;;  %v1358_v63 = vpack.c.bf16 %v1318_v59, %v1317_v58 }
 0x21d   :  { %v1089_v0 = vadd.f32 %v2732_v60, %v3370_v49  ;;  %v1080_v1 = vpop.f32.mrb[49].mxu1  ;;  %v1357_v2 = vpack.c.bf16 %v1316_v62, %v1315_v61 }
 0x21e   :  { %v1081_v3 = vadd.f32 %v3370_v49, %v1080_v1  ;;  %v2733_v4 = vpop.f32.mrb[50].mxu1 }
 0x21f   :  { %v1257_v5 = vmul.f32 0.01, %v1089_v0  ;;  %v1092_v6 = vadd.f32 %v2733_v4, %v3370_v49  ;;  %v1083_v7 = vpop.f32.mrb[51].mxu1  ;;  %2806 = vmatprep.mubr.bf16.mxu0 %v1357_v2  ;;  %vm1193_vm1 = vcmp.ge.f32.partialorder %v1089_v0, 0.0 }
 0x220   :  { %v1255_v8 = vmul.f32 0.01, %v1081_v3  ;;  %v1084_v9 = vadd.f32 %v3370_v49, %v1083_v7  ;;  %2807 = vmatmul.mubr.bf16.gmra.mrb[108].mxu0 %v1358_v63  ;;  %vm1191_vm2 = vcmp.ge.f32.partialorder %v1081_v3, 0.0 }
 0x221   :  { %vm1194_vm3 = vcmp.ge.f32.partialorder %v1092_v6, 0.0  ;;  %v1258_v10 = vmul.f32 0.01, %v1092_v6  ;;  %v1321_v13 = vsel %vm1193_vm1, %v1089_v0, %v1257_v5 }
 0x222   :  { %vm1192_vm4 = vcmp.ge.f32.partialorder %v1084_v9, 0.0  ;;  %v1256_v12 = vmul.f32 0.01, %v1084_v9  ;;  %v1319_v16 = vsel %vm1191_vm2, %v1081_v3, %v1255_v8 }
 0x223   :  { %v1322_v14 = vsel %vm1194_vm3, %v1092_v6, %v1258_v10  ;;  %v3496_v10 = vld [vmem:[%s3896_s8] ss:$0 sm:$0xff] }
 0x224   :  { %v2736_v15 = vpop.f32.mrb[52].mxu1  ;;  %v1320_v17 = vsel %vm1192_vm4, %v1084_v9, %v1256_v12  ;;  %v1360_v18 = vpack.c.bf16 %v1322_v14, %v1321_v13 }
 0x225   :  { %v1105_v19 = vadd.f32 %v2736_v15, %v3370_v49  ;;  %v1096_v20 = vpop.f32.mrb[53].mxu1  ;;  %v1359_v21 = vpack.c.bf16 %v1320_v17, %v1319_v16 }
 0x226   :  { %v1097_v22 = vadd.f32 %v3370_v49, %v1096_v20  ;;  %v2737_v23 = vpop.f32.mrb[54].mxu1 }
 0x227   :  { %v1261_v24 = vmul.f32 0.01, %v1105_v19  ;;  %v1108_v25 = vadd.f32 %v2737_v23, %v3370_v49  ;;  %v1099_v26 = vpop.f32.mrb[55].mxu1  ;;  %2810 = vmatprep.mubr.bf16.mxu0 %v1359_v21  ;;  %vm1197_vm5 = vcmp.ge.f32.partialorder %v1105_v19, 0.0 }
 0x228   :  { %v1259_v27 = vmul.f32 0.01, %v1097_v22  ;;  %v1100_v28 = vadd.f32 %v3370_v49, %v1099_v26  ;;  %2811 = vmatmul.mubr.bf16.gmra.mrb[112].mxu0 %v1360_v18  ;;  %vm1195_vm6 = vcmp.ge.f32.partialorder %v1097_v22, 0.0 }
 0x229   :  { %vm1198_vm7 = vcmp.ge.f32.partialorder %v1108_v25, 0.0  ;;  %v1262_v29 = vmul.f32 0.01, %v1108_v25  ;;  %v1325_v31 = vsel %vm1197_vm5, %v1105_v19, %v1261_v24 }
 0x22a   :  { %vm1196_vm8 = vcmp.ge.f32.partialorder %v1100_v28, 0.0  ;;  %v1260_v30 = vmul.f32 0.01, %v1100_v28  ;;  %v1323_v34 = vsel %vm1195_vm6, %v1097_v22, %v1259_v27 }
 0x22b   :  { %v1326_v32 = vsel %vm1198_vm7, %v1108_v25, %v1262_v29 }
 0x22c   :  { %v2740_v33 = vpop.f32.mrb[56].mxu1  ;;  %v1324_v35 = vsel %vm1196_vm8, %v1100_v28, %v1260_v30  ;;  %v1362_v36 = vpack.c.bf16 %v1326_v32, %v1325_v31 }
 0x22d   :  { %v1121_v37 = vadd.f32 %v2740_v33, %v3370_v49  ;;  %v1112_v38 = vpop.f32.mrb[57].mxu1  ;;  %v1361_v39 = vpack.c.bf16 %v1324_v35, %v1323_v34 }
 0x22e   :  { %v1113_v40 = vadd.f32 %v3370_v49, %v1112_v38  ;;  %v2741_v41 = vpop.f32.mrb[58].mxu1 }
 0x22f   :  { %v1265_v42 = vmul.f32 0.01, %v1121_v37  ;;  %v1124_v43 = vadd.f32 %v2741_v41, %v3370_v49  ;;  %v1115_v44 = vpop.f32.mrb[59].mxu1  ;;  %2814 = vmatprep.mubr.bf16.mxu0 %v1361_v39  ;;  %vm1201_vm9 = vcmp.ge.f32.partialorder %v1121_v37, 0.0 }
 0x230   :  { %v1263_v45 = vmul.f32 0.01, %v1113_v40  ;;  %v1116_v46 = vadd.f32 %v3370_v49, %v1115_v44  ;;  %2815 = vmatmul.mubr.bf16.gmra.mrb[116].mxu0 %v1362_v36  ;;  %vm1199_vm10 = vcmp.ge.f32.partialorder %v1113_v40, 0.0 }
 0x231   :  { %vm1202_vm11 = vcmp.ge.f32.partialorder %v1124_v43, 0.0  ;;  %v1266_v47 = vmul.f32 0.01, %v1124_v43  ;;  %v1329_v50 = vsel %vm1201_vm9, %v1121_v37, %v1265_v42 }
 0x232   :  { %vm1200_vm12 = vcmp.ge.f32.partialorder %v1116_v46, 0.0  ;;  %v1264_v48 = vmul.f32 0.01, %v1116_v46  ;;  %v1327_v53 = vsel %vm1199_vm10, %v1113_v40, %v1263_v45 }
 0x233   :  { %v1330_v51 = vsel %vm1202_vm11, %v1124_v43, %v1266_v47 }
 0x234   :  { %v2744_v52 = vpop.f32.mrb[60].mxu1  ;;  %v1328_v54 = vsel %vm1200_vm12, %v1116_v46, %v1264_v48  ;;  %v1364_v55 = vpack.c.bf16 %v1330_v51, %v1329_v50 }
 0x235   :  { %v1137_v56 = vadd.f32 %v2744_v52, %v3370_v49  ;;  %v1128_v57 = vpop.f32.mrb[61].mxu1  ;;  %v1363_v58 = vpack.c.bf16 %v1328_v54, %v1327_v53 }
 0x236   :  { %v1129_v59 = vadd.f32 %v3370_v49, %v1128_v57  ;;  %v2745_v60 = vpop.f32.mrb[62].mxu1 }
 0x237   :  { %v1269_v61 = vmul.f32 0.01, %v1137_v56  ;;  %v1140_v62 = vadd.f32 %v2745_v60, %v3370_v49  ;;  %v1131_v63 = vpop.f32.mrb[63].mxu1  ;;  %2818 = vmatprep.mubr.bf16.mxu0 %v1363_v58  ;;  %vm1205_vm13 = vcmp.ge.f32.partialorder %v1137_v56, 0.0 }
 0x238   :  { %v1267_v0 = vmul.f32 0.01, %v1129_v59  ;;  %v1132_v1 = vadd.f32 %v3370_v49, %v1131_v63  ;;  %2819 = vmatmul.mubr.bf16.gmra.mrb[120].mxu0 %v1364_v55  ;;  %vm1203_vm14 = vcmp.ge.f32.partialorder %v1129_v59, 0.0 }
 0x239   :  { %vm1206_vm15 = vcmp.ge.f32.partialorder %v1140_v62, 0.0  ;;  %v1270_v2 = vmul.f32 0.01, %v1140_v62  ;;  %v1333_v4 = vsel %vm1205_vm13, %v1137_v56, %v1269_v61 }
 0x23a   :  { %vm1204_vm0 = vcmp.ge.f32.partialorder %v1132_v1, 0.0  ;;  %v1268_v3 = vmul.f32 0.01, %v1132_v1  ;;  %v1331_v6 = vsel %vm1203_vm14, %v1129_v59, %v1267_v0 }
 0x23b   :  { %v1334_v5 = vsel %vm1206_vm15, %v1140_v62, %v1270_v2 }
 0x23c   :  { %v1332_v7 = vsel %vm1204_vm0, %v1132_v1, %v1268_v3  ;;  %v1366_v8 = vpack.c.bf16 %v1334_v5, %v1333_v4 }
 0x23d   :  { %v1365_v9 = vpack.c.bf16 %v1332_v7, %v1331_v6 }
 0x23f   :  { %2822 = vmatprep.mubr.bf16.mxu0 %v1365_v9 }
 0x240   :  { %2823 = vmatmul.mubr.bf16.gmra.mrb[124].mxu0 %v1366_v8 }
 0x29b   :  { %v2764_v49 = vpop.f32.mrb[64].mxu0 }
 0x29c   :  { %v1481_v11 = vadd.f32 %v2764_v49, %v3496_v10  ;;  %v1472_v12 = vpop.f32.mrb[65].mxu0 }
 0x29d   :  { %v1473_v13 = vadd.f32 %v3496_v10, %v1472_v12  ;;  %v2765_v14 = vpop.f32.mrb[66].mxu0 }
 0x29e   :  { %v1793_v15 = vmul.f32 0.01, %v1481_v11  ;;  %v1484_v16 = vadd.f32 %v2765_v14, %v3496_v10  ;;  %v1475_v17 = vpop.f32.mrb[67].mxu0  ;;  %vm1729_vm1 = vcmp.ge.f32.partialorder %v1481_v11, 0.0 }
 0x29f   :  { %v1791_v18 = vmul.f32 0.01, %v1473_v13  ;;  %v1476_v19 = vadd.f32 %v3496_v10, %v1475_v17  ;;  %vm1727_vm2 = vcmp.ge.f32.partialorder %v1473_v13, 0.0 }
 0x2a0   :  { %vm1730_vm3 = vcmp.ge.f32.partialorder %v1484_v16, 0.0  ;;  %v1794_v20 = vmul.f32 0.01, %v1484_v16  ;;  %v1857_v22 = vsel %vm1729_vm1, %v1481_v11, %v1793_v15 }
 0x2a1   :  { %vm1728_vm4 = vcmp.ge.f32.partialorder %v1476_v19, 0.0  ;;  %v1792_v21 = vmul.f32 0.01, %v1476_v19  ;;  %v1855_v26 = vsel %vm1727_vm2, %v1473_v13, %v1791_v18 }
 0x2a2   :  { %v1858_v23 = vsel %vm1730_vm3, %v1484_v16, %v1794_v20 }
 0x2a3   :  { %v1920_v24 = vpack.c.bf16 %v1858_v23, %v1857_v22  ;;  %v2768_v25 = vpop.f32.mrb[68].mxu0  ;;  %v1856_v27 = vsel %vm1728_vm4, %v1476_v19, %v1792_v21 }
 0x2a4   :  { %v1497_v28 = vadd.f32 %v2768_v25, %v3496_v10  ;;  %v1488_v29 = vpop.f32.mrb[69].mxu0  ;;  %v1919_v30 = vpack.c.bf16 %v1856_v27, %v1855_v26 }
 0x2a5   :  { %v1489_v31 = vadd.f32 %v3496_v10, %v1488_v29  ;;  %v2769_v32 = vpop.f32.mrb[70].mxu0 }
 0x2a6   :  { %v1797_v33 = vmul.f32 0.01, %v1497_v28  ;;  %v1500_v34 = vadd.f32 %v2769_v32, %v3496_v10  ;;  %v1491_v35 = vpop.f32.mrb[71].mxu0  ;;  %2842 = vmatprep.mubr.bf16.mxu0 %v1919_v30  ;;  %vm1733_vm5 = vcmp.ge.f32.partialorder %v1497_v28, 0.0 }
 0x2a7   :  { %v1795_v36 = vmul.f32 0.01, %v1489_v31  ;;  %v1492_v37 = vadd.f32 %v3496_v10, %v1491_v35  ;;  %2843 = vmatmul.mubr.bf16.vlgmr.msra.gmra.mrb[128].mxu0 %v1920_v24  ;;  %vm1731_vm6 = vcmp.ge.f32.partialorder %v1489_v31, 0.0 }
 0x2a8   :  { %vm1734_vm7 = vcmp.ge.f32.partialorder %v1500_v34, 0.0  ;;  %v1798_v38 = vmul.f32 0.01, %v1500_v34  ;;  %v1861_v40 = vsel %vm1733_vm5, %v1497_v28, %v1797_v33 }
 0x2a9   :  { %vm1732_vm8 = vcmp.ge.f32.partialorder %v1492_v37, 0.0  ;;  %v1796_v39 = vmul.f32 0.01, %v1492_v37  ;;  %v1859_v44 = vsel %vm1731_vm6, %v1489_v31, %v1795_v36 }
 0x2aa   :  { %v1862_v41 = vsel %vm1734_vm7, %v1500_v34, %v1798_v38 }
 0x2ab   :  { %v1922_v42 = vpack.c.bf16 %v1862_v41, %v1861_v40  ;;  %v2772_v43 = vpop.f32.mrb[72].mxu0  ;;  %v1860_v45 = vsel %vm1732_vm8, %v1492_v37, %v1796_v39 }
 0x2ac   :  { %v1513_v46 = vadd.f32 %v2772_v43, %v3496_v10  ;;  %v1504_v47 = vpop.f32.mrb[73].mxu0  ;;  %v1921_v48 = vpack.c.bf16 %v1860_v45, %v1859_v44 }
 0x2ad   :  { %v1505_v50 = vadd.f32 %v3496_v10, %v1504_v47  ;;  %v2773_v51 = vpop.f32.mrb[74].mxu0 }
 0x2ae   :  { %v1801_v52 = vmul.f32 0.01, %v1513_v46  ;;  %v1516_v53 = vadd.f32 %v2773_v51, %v3496_v10  ;;  %v1507_v54 = vpop.f32.mrb[75].mxu0  ;;  %2846 = vmatprep.mubr.bf16.mxu1 %v1921_v48  ;;  %vm1737_vm9 = vcmp.ge.f32.partialorder %v1513_v46, 0.0 }
 0x2af   :  { %v1799_v55 = vmul.f32 0.01, %v1505_v50  ;;  %v1508_v56 = vadd.f32 %v3496_v10, %v1507_v54  ;;  %2847 = vmatmul.mubr.bf16.vlgmr.msra.gmra.mrb[64].mxu1 %v1922_v42  ;;  %vm1735_vm10 = vcmp.ge.f32.partialorder %v1505_v50, 0.0 }
 0x2b0   :  { %vm1738_vm11 = vcmp.ge.f32.partialorder %v1516_v53, 0.0  ;;  %v1802_v57 = vmul.f32 0.01, %v1516_v53  ;;  %v1865_v59 = vsel %vm1737_vm9, %v1513_v46, %v1801_v52 }
 0x2b1   :  { %vm1736_vm12 = vcmp.ge.f32.partialorder %v1508_v56, 0.0  ;;  %v1800_v58 = vmul.f32 0.01, %v1508_v56  ;;  %v1863_v62 = vsel %vm1735_vm10, %v1505_v50, %v1799_v55 }
 0x2b2   :  { %v1866_v60 = vsel %vm1738_vm11, %v1516_v53, %v1802_v57 }
 0x2b3   :  { %v2776_v61 = vpop.f32.mrb[76].mxu0  ;;  %v1864_v63 = vsel %vm1736_vm12, %v1508_v56, %v1800_v58  ;;  %v1924_v0 = vpack.c.bf16 %v1866_v60, %v1865_v59 }
 0x2b4   :  { %v1529_v1 = vadd.f32 %v2776_v61, %v3496_v10  ;;  %v1520_v2 = vpop.f32.mrb[77].mxu0  ;;  %v1923_v3 = vpack.c.bf16 %v1864_v63, %v1863_v62 }
 0x2b5   :  { %v1521_v4 = vadd.f32 %v3496_v10, %v1520_v2  ;;  %v2777_v5 = vpop.f32.mrb[78].mxu0 }
 0x2b6   :  { %v1805_v6 = vmul.f32 0.01, %v1529_v1  ;;  %v1532_v7 = vadd.f32 %v2777_v5, %v3496_v10  ;;  %v1523_v8 = vpop.f32.mrb[79].mxu0  ;;  %2850 = vmatprep.mubr.bf16.mxu1 %v1923_v3  ;;  %vm1741_vm13 = vcmp.ge.f32.partialorder %v1529_v1, 0.0 }
 0x2b7   :  { %v1803_v9 = vmul.f32 0.01, %v1521_v4  ;;  %v1524_v49 = vadd.f32 %v3496_v10, %v1523_v8  ;;  %2851 = vmatmul.mubr.bf16.gmra.mrb[68].mxu1 %v1924_v0  ;;  %vm1739_vm14 = vcmp.ge.f32.partialorder %v1521_v4, 0.0 }
 0x2b8   :  { %vm1742_vm15 = vcmp.ge.f32.partialorder %v1532_v7, 0.0  ;;  %v1806_v11 = vmul.f32 0.01, %v1532_v7  ;;  %v1869_v13 = vsel %vm1741_vm13, %v1529_v1, %v1805_v6 }
 0x2b9   :  { %vm1740_vm0 = vcmp.ge.f32.partialorder %v1524_v49, 0.0  ;;  %v1804_v12 = vmul.f32 0.01, %v1524_v49  ;;  %v1867_v16 = vsel %vm1739_vm14, %v1521_v4, %v1803_v9 }
 0x2ba   :  { %v1870_v14 = vsel %vm1742_vm15, %v1532_v7, %v1806_v11 }
 0x2bb   :  { %v2780_v15 = vpop.f32.mrb[80].mxu0  ;;  %v1868_v17 = vsel %vm1740_vm0, %v1524_v49, %v1804_v12  ;;  %v1926_v18 = vpack.c.bf16 %v1870_v14, %v1869_v13 }
 0x2bc   :  { %v1545_v19 = vadd.f32 %v2780_v15, %v3496_v10  ;;  %v1536_v20 = vpop.f32.mrb[81].mxu0  ;;  %v1925_v21 = vpack.c.bf16 %v1868_v17, %v1867_v16 }
 0x2bd   :  { %v1537_v22 = vadd.f32 %v3496_v10, %v1536_v20  ;;  %v2781_v23 = vpop.f32.mrb[82].mxu0 }
 0x2be   :  { %v1809_v24 = vmul.f32 0.01, %v1545_v19  ;;  %v1548_v25 = vadd.f32 %v2781_v23, %v3496_v10  ;;  %v1539_v26 = vpop.f32.mrb[83].mxu0  ;;  %2854 = vmatprep.mubr.bf16.mxu1 %v1925_v21  ;;  %vm1745_vm1 = vcmp.ge.f32.partialorder %v1545_v19, 0.0 }
 0x2bf   :  { %v1807_v27 = vmul.f32 0.01, %v1537_v22  ;;  %v1540_v28 = vadd.f32 %v3496_v10, %v1539_v26  ;;  %2855 = vmatmul.mubr.bf16.gmra.mrb[72].mxu1 %v1926_v18  ;;  %vm1743_vm2 = vcmp.ge.f32.partialorder %v1537_v22, 0.0 }
 0x2c0   :  { %vm1746_vm3 = vcmp.ge.f32.partialorder %v1548_v25, 0.0  ;;  %v1810_v29 = vmul.f32 0.01, %v1548_v25  ;;  %v1873_v31 = vsel %vm1745_vm1, %v1545_v19, %v1809_v24 }
 0x2c1   :  { %vm1744_vm4 = vcmp.ge.f32.partialorder %v1540_v28, 0.0  ;;  %v1808_v30 = vmul.f32 0.01, %v1540_v28  ;;  %v1871_v34 = vsel %vm1743_vm2, %v1537_v22, %v1807_v27 }
 0x2c2   :  { %v1874_v32 = vsel %vm1746_vm3, %v1548_v25, %v1810_v29 }
 0x2c3   :  { %v2784_v33 = vpop.f32.mrb[84].mxu0  ;;  %v1872_v35 = vsel %vm1744_vm4, %v1540_v28, %v1808_v30  ;;  %v1928_v36 = vpack.c.bf16 %v1874_v32, %v1873_v31 }
 0x2c4   :  { %v1561_v37 = vadd.f32 %v2784_v33, %v3496_v10  ;;  %v1552_v38 = vpop.f32.mrb[85].mxu0  ;;  %v1927_v39 = vpack.c.bf16 %v1872_v35, %v1871_v34 }
 0x2c5   :  { %v1553_v40 = vadd.f32 %v3496_v10, %v1552_v38  ;;  %v2785_v41 = vpop.f32.mrb[86].mxu0 }
 0x2c6   :  { %v1813_v42 = vmul.f32 0.01, %v1561_v37  ;;  %v1564_v43 = vadd.f32 %v2785_v41, %v3496_v10  ;;  %v1555_v44 = vpop.f32.mrb[87].mxu0  ;;  %2858 = vmatprep.mubr.bf16.mxu1 %v1927_v39  ;;  %vm1749_vm5 = vcmp.ge.f32.partialorder %v1561_v37, 0.0 }
 0x2c7   :  { %v1811_v45 = vmul.f32 0.01, %v1553_v40  ;;  %v1556_v46 = vadd.f32 %v3496_v10, %v1555_v44  ;;  %2859 = vmatmul.mubr.bf16.gmra.mrb[76].mxu1 %v1928_v36  ;;  %vm1747_vm6 = vcmp.ge.f32.partialorder %v1553_v40, 0.0 }
 0x2c8   :  { %vm1750_vm7 = vcmp.ge.f32.partialorder %v1564_v43, 0.0  ;;  %v1814_v47 = vmul.f32 0.01, %v1564_v43  ;;  %v1877_v50 = vsel %vm1749_vm5, %v1561_v37, %v1813_v42 }
 0x2c9   :  { %vm1748_vm8 = vcmp.ge.f32.partialorder %v1556_v46, 0.0  ;;  %v1812_v48 = vmul.f32 0.01, %v1556_v46  ;;  %v1875_v53 = vsel %vm1747_vm6, %v1553_v40, %v1811_v45 }
 0x2ca   :  { %v1878_v51 = vsel %vm1750_vm7, %v1564_v43, %v1814_v47 }
 0x2cb   :  { %v2788_v52 = vpop.f32.mrb[88].mxu0  ;;  %v1876_v54 = vsel %vm1748_vm8, %v1556_v46, %v1812_v48  ;;  %v1930_v55 = vpack.c.bf16 %v1878_v51, %v1877_v50 }
 0x2cc   :  { %v1577_v56 = vadd.f32 %v2788_v52, %v3496_v10  ;;  %v1568_v57 = vpop.f32.mrb[89].mxu0  ;;  %v1929_v58 = vpack.c.bf16 %v1876_v54, %v1875_v53 }
 0x2cd   :  { %v1569_v59 = vadd.f32 %v3496_v10, %v1568_v57  ;;  %v2789_v60 = vpop.f32.mrb[90].mxu0 }
 0x2ce   :  { %v1817_v61 = vmul.f32 0.01, %v1577_v56  ;;  %v1580_v62 = vadd.f32 %v2789_v60, %v3496_v10  ;;  %v1571_v63 = vpop.f32.mrb[91].mxu0  ;;  %2862 = vmatprep.mubr.bf16.mxu1 %v1929_v58  ;;  %vm1753_vm9 = vcmp.ge.f32.partialorder %v1577_v56, 0.0 }
 0x2cf   :  { %v1815_v0 = vmul.f32 0.01, %v1569_v59  ;;  %v1572_v1 = vadd.f32 %v3496_v10, %v1571_v63  ;;  %2863 = vmatmul.mubr.bf16.gmra.mrb[80].mxu1 %v1930_v55  ;;  %vm1751_vm10 = vcmp.ge.f32.partialorder %v1569_v59, 0.0 }
 0x2d0   :  { %vm1754_vm11 = vcmp.ge.f32.partialorder %v1580_v62, 0.0  ;;  %v1818_v2 = vmul.f32 0.01, %v1580_v62  ;;  %v1881_v4 = vsel %vm1753_vm9, %v1577_v56, %v1817_v61 }
 0x2d1   :  { %vm1752_vm12 = vcmp.ge.f32.partialorder %v1572_v1, 0.0  ;;  %v1816_v3 = vmul.f32 0.01, %v1572_v1  ;;  %v1879_v7 = vsel %vm1751_vm10, %v1569_v59, %v1815_v0 }
 0x2d2   :  { %v1882_v5 = vsel %vm1754_vm11, %v1580_v62, %v1818_v2 }
 0x2d3   :  { %v2792_v6 = vpop.f32.mrb[92].mxu0  ;;  %v1880_v8 = vsel %vm1752_vm12, %v1572_v1, %v1816_v3  ;;  %v1932_v9 = vpack.c.bf16 %v1882_v5, %v1881_v4 }
 0x2d4   :  { %v1593_v49 = vadd.f32 %v2792_v6, %v3496_v10  ;;  %v1584_v11 = vpop.f32.mrb[93].mxu0  ;;  %v1931_v12 = vpack.c.bf16 %v1880_v8, %v1879_v7 }
 0x2d5   :  { %v1585_v13 = vadd.f32 %v3496_v10, %v1584_v11  ;;  %v2793_v14 = vpop.f32.mrb[94].mxu0 }
 0x2d6   :  { %v1821_v15 = vmul.f32 0.01, %v1593_v49  ;;  %v1596_v16 = vadd.f32 %v2793_v14, %v3496_v10  ;;  %v1587_v17 = vpop.f32.mrb[95].mxu0  ;;  %2866 = vmatprep.mubr.bf16.mxu1 %v1931_v12  ;;  %vm1757_vm13 = vcmp.ge.f32.partialorder %v1593_v49, 0.0 }
 0x2d7   :  { %v1819_v18 = vmul.f32 0.01, %v1585_v13  ;;  %v1588_v19 = vadd.f32 %v3496_v10, %v1587_v17  ;;  %2867 = vmatmul.mubr.bf16.gmra.mrb[84].mxu1 %v1932_v9  ;;  %vm1755_vm14 = vcmp.ge.f32.partialorder %v1585_v13, 0.0 }
 0x2d8   :  { %vm1758_vm15 = vcmp.ge.f32.partialorder %v1596_v16, 0.0  ;;  %v1822_v20 = vmul.f32 0.01, %v1596_v16  ;;  %v1885_v22 = vsel %vm1757_vm13, %v1593_v49, %v1821_v15 }
 0x2d9   :  { %vm1756_vm0 = vcmp.ge.f32.partialorder %v1588_v19, 0.0  ;;  %v1820_v21 = vmul.f32 0.01, %v1588_v19  ;;  %v1883_v25 = vsel %vm1755_vm14, %v1585_v13, %v1819_v18 }
 0x2da   :  { %v1886_v23 = vsel %vm1758_vm15, %v1596_v16, %v1822_v20 }
 0x2db   :  { %v2796_v24 = vpop.f32.mrb[96].mxu0  ;;  %v1884_v26 = vsel %vm1756_vm0, %v1588_v19, %v1820_v21  ;;  %v1934_v27 = vpack.c.bf16 %v1886_v23, %v1885_v22 }
 0x2dc   :  { %v1609_v28 = vadd.f32 %v2796_v24, %v3496_v10  ;;  %v1600_v29 = vpop.f32.mrb[97].mxu0  ;;  %v1933_v30 = vpack.c.bf16 %v1884_v26, %v1883_v25 }
 0x2dd   :  { %v1601_v31 = vadd.f32 %v3496_v10, %v1600_v29  ;;  %v2797_v32 = vpop.f32.mrb[98].mxu0 }
 0x2de   :  { %v1825_v33 = vmul.f32 0.01, %v1609_v28  ;;  %v1612_v34 = vadd.f32 %v2797_v32, %v3496_v10  ;;  %v1603_v35 = vpop.f32.mrb[99].mxu0  ;;  %2870 = vmatprep.mubr.bf16.mxu1 %v1933_v30  ;;  %vm1761_vm1 = vcmp.ge.f32.partialorder %v1609_v28, 0.0 }
 0x2df   :  { %v1823_v36 = vmul.f32 0.01, %v1601_v31  ;;  %v1604_v37 = vadd.f32 %v3496_v10, %v1603_v35  ;;  %2871 = vmatmul.mubr.bf16.gmra.mrb[88].mxu1 %v1934_v27  ;;  %vm1759_vm2 = vcmp.ge.f32.partialorder %v1601_v31, 0.0 }
 0x2e0   :  { %vm1762_vm3 = vcmp.ge.f32.partialorder %v1612_v34, 0.0  ;;  %v1826_v38 = vmul.f32 0.01, %v1612_v34  ;;  %v1889_v40 = vsel %vm1761_vm1, %v1609_v28, %v1825_v33 }
 0x2e1   :  { %vm1760_vm4 = vcmp.ge.f32.partialorder %v1604_v37, 0.0  ;;  %v1824_v39 = vmul.f32 0.01, %v1604_v37  ;;  %v1887_v43 = vsel %vm1759_vm2, %v1601_v31, %v1823_v36 }
 0x2e2   :  { %v1890_v41 = vsel %vm1762_vm3, %v1612_v34, %v1826_v38 }
 0x2e3   :  { %v2800_v42 = vpop.f32.mrb[100].mxu0  ;;  %v1888_v44 = vsel %vm1760_vm4, %v1604_v37, %v1824_v39  ;;  %v1936_v45 = vpack.c.bf16 %v1890_v41, %v1889_v40 }
 0x2e4   :  { %v1625_v46 = vadd.f32 %v2800_v42, %v3496_v10  ;;  %v1616_v47 = vpop.f32.mrb[101].mxu0  ;;  %v1935_v48 = vpack.c.bf16 %v1888_v44, %v1887_v43 }
 0x2e5   :  { %v1617_v50 = vadd.f32 %v3496_v10, %v1616_v47  ;;  %v2801_v51 = vpop.f32.mrb[102].mxu0 }
 0x2e6   :  { %v1829_v52 = vmul.f32 0.01, %v1625_v46  ;;  %v1628_v53 = vadd.f32 %v2801_v51, %v3496_v10  ;;  %v1619_v54 = vpop.f32.mrb[103].mxu0  ;;  %2874 = vmatprep.mubr.bf16.mxu1 %v1935_v48  ;;  %vm1765_vm5 = vcmp.ge.f32.partialorder %v1625_v46, 0.0 }
 0x2e7   :  { %v1827_v55 = vmul.f32 0.01, %v1617_v50  ;;  %v1620_v56 = vadd.f32 %v3496_v10, %v1619_v54  ;;  %2875 = vmatmul.mubr.bf16.gmra.mrb[92].mxu1 %v1936_v45  ;;  %vm1763_vm6 = vcmp.ge.f32.partialorder %v1617_v50, 0.0 }
 0x2e8   :  { %vm1766_vm7 = vcmp.ge.f32.partialorder %v1628_v53, 0.0  ;;  %v1830_v57 = vmul.f32 0.01, %v1628_v53  ;;  %v1893_v59 = vsel %vm1765_vm5, %v1625_v46, %v1829_v52 }
 0x2e9   :  { %vm1764_vm8 = vcmp.ge.f32.partialorder %v1620_v56, 0.0  ;;  %v1828_v58 = vmul.f32 0.01, %v1620_v56  ;;  %v1891_v62 = vsel %vm1763_vm6, %v1617_v50, %v1827_v55 }
 0x2ea   :  { %v1894_v60 = vsel %vm1766_vm7, %v1628_v53, %v1830_v57 }
 0x2eb   :  { %v2804_v61 = vpop.f32.mrb[104].mxu0  ;;  %v1892_v63 = vsel %vm1764_vm8, %v1620_v56, %v1828_v58  ;;  %v1938_v0 = vpack.c.bf16 %v1894_v60, %v1893_v59 }
 0x2ec   :  { %v1641_v1 = vadd.f32 %v2804_v61, %v3496_v10  ;;  %v1632_v2 = vpop.f32.mrb[105].mxu0  ;;  %v1937_v3 = vpack.c.bf16 %v1892_v63, %v1891_v62 }
 0x2ed   :  { %v1633_v4 = vadd.f32 %v3496_v10, %v1632_v2  ;;  %v2805_v5 = vpop.f32.mrb[106].mxu0 }
 0x2ee   :  { %v1833_v6 = vmul.f32 0.01, %v1641_v1  ;;  %v1644_v7 = vadd.f32 %v2805_v5, %v3496_v10  ;;  %v1635_v8 = vpop.f32.mrb[107].mxu0  ;;  %2878 = vmatprep.mubr.bf16.mxu1 %v1937_v3  ;;  %vm1769_vm9 = vcmp.ge.f32.partialorder %v1641_v1, 0.0 }
 0x2ef   :  { %v1831_v9 = vmul.f32 0.01, %v1633_v4  ;;  %v1636_v49 = vadd.f32 %v3496_v10, %v1635_v8  ;;  %2879 = vmatmul.mubr.bf16.gmra.mrb[96].mxu1 %v1938_v0  ;;  %vm1767_vm10 = vcmp.ge.f32.partialorder %v1633_v4, 0.0 }
 0x2f0   :  { %vm1770_vm11 = vcmp.ge.f32.partialorder %v1644_v7, 0.0  ;;  %v1834_v11 = vmul.f32 0.01, %v1644_v7  ;;  %v1897_v13 = vsel %vm1769_vm9, %v1641_v1, %v1833_v6 }
 0x2f1   :  { %vm1768_vm12 = vcmp.ge.f32.partialorder %v1636_v49, 0.0  ;;  %v1832_v12 = vmul.f32 0.01, %v1636_v49  ;;  %v1895_v16 = vsel %vm1767_vm10, %v1633_v4, %v1831_v9 }
 0x2f2   :  { %v1898_v14 = vsel %vm1770_vm11, %v1644_v7, %v1834_v11 }
 0x2f3   :  { %v2808_v15 = vpop.f32.mrb[108].mxu0  ;;  %v1896_v17 = vsel %vm1768_vm12, %v1636_v49, %v1832_v12  ;;  %v1940_v18 = vpack.c.bf16 %v1898_v14, %v1897_v13 }
 0x2f4   :  { %v1657_v19 = vadd.f32 %v2808_v15, %v3496_v10  ;;  %v1648_v20 = vpop.f32.mrb[109].mxu0  ;;  %v1939_v21 = vpack.c.bf16 %v1896_v17, %v1895_v16 }
 0x2f5   :  { %v1649_v22 = vadd.f32 %v3496_v10, %v1648_v20  ;;  %v2809_v23 = vpop.f32.mrb[110].mxu0 }
 0x2f6   :  { %v1837_v24 = vmul.f32 0.01, %v1657_v19  ;;  %v1660_v25 = vadd.f32 %v2809_v23, %v3496_v10  ;;  %v1651_v26 = vpop.f32.mrb[111].mxu0  ;;  %2882 = vmatprep.mubr.bf16.mxu1 %v1939_v21  ;;  %vm1773_vm13 = vcmp.ge.f32.partialorder %v1657_v19, 0.0 }
 0x2f7   :  { %v1835_v27 = vmul.f32 0.01, %v1649_v22  ;;  %v1652_v28 = vadd.f32 %v3496_v10, %v1651_v26  ;;  %2883 = vmatmul.mubr.bf16.gmra.mrb[100].mxu1 %v1940_v18  ;;  %vm1771_vm14 = vcmp.ge.f32.partialorder %v1649_v22, 0.0 }
 0x2f8   :  { %vm1774_vm15 = vcmp.ge.f32.partialorder %v1660_v25, 0.0  ;;  %v1838_v29 = vmul.f32 0.01, %v1660_v25  ;;  %v1901_v31 = vsel %vm1773_vm13, %v1657_v19, %v1837_v24 }
 0x2f9   :  { %vm1772_vm0 = vcmp.ge.f32.partialorder %v1652_v28, 0.0  ;;  %v1836_v30 = vmul.f32 0.01, %v1652_v28  ;;  %v1899_v34 = vsel %vm1771_vm14, %v1649_v22, %v1835_v27 }
 0x2fa   :  { %v1902_v32 = vsel %vm1774_vm15, %v1660_v25, %v1838_v29 }
 0x2fb   :  { %v2812_v33 = vpop.f32.mrb[112].mxu0  ;;  %v1900_v35 = vsel %vm1772_vm0, %v1652_v28, %v1836_v30  ;;  %v1942_v36 = vpack.c.bf16 %v1902_v32, %v1901_v31 }
 0x2fc   :  { %v1673_v37 = vadd.f32 %v2812_v33, %v3496_v10  ;;  %v1664_v38 = vpop.f32.mrb[113].mxu0  ;;  %v1941_v39 = vpack.c.bf16 %v1900_v35, %v1899_v34 }
 0x2fd   :  { %v1665_v40 = vadd.f32 %v3496_v10, %v1664_v38  ;;  %v2813_v41 = vpop.f32.mrb[114].mxu0 }
 0x2fe   :  { %v1841_v42 = vmul.f32 0.01, %v1673_v37  ;;  %v1676_v43 = vadd.f32 %v2813_v41, %v3496_v10  ;;  %v1667_v44 = vpop.f32.mrb[115].mxu0  ;;  %2886 = vmatprep.mubr.bf16.mxu1 %v1941_v39  ;;  %vm1777_vm1 = vcmp.ge.f32.partialorder %v1673_v37, 0.0 }
 0x2ff   :  { %v1839_v45 = vmul.f32 0.01, %v1665_v40  ;;  %v1668_v46 = vadd.f32 %v3496_v10, %v1667_v44  ;;  %2887 = vmatmul.mubr.bf16.gmra.mrb[104].mxu1 %v1942_v36  ;;  %vm1775_vm2 = vcmp.ge.f32.partialorder %v1665_v40, 0.0 }
 0x300   :  { %vm1778_vm3 = vcmp.ge.f32.partialorder %v1676_v43, 0.0  ;;  %v1842_v47 = vmul.f32 0.01, %v1676_v43  ;;  %v1905_v50 = vsel %vm1777_vm1, %v1673_v37, %v1841_v42  ;;  %vm2311_vm1 = vcmask 130048  }
 0x301   :  { %vm1776_vm4 = vcmp.ge.f32.partialorder %v1668_v46, 0.0  ;;  %v1840_v48 = vmul.f32 0.01, %v1668_v46  ;;  %v1903_v53 = vsel %vm1775_vm2, %v1665_v40, %v1839_v45 }
 0x302   :  { %v1906_v51 = vsel %vm1778_vm3, %v1676_v43, %v1842_v47 }
 0x303   :  { %v2816_v52 = vpop.f32.mrb[116].mxu0  ;;  %v1904_v54 = vsel %vm1776_vm4, %v1668_v46, %v1840_v48  ;;  %v1944_v55 = vpack.c.bf16 %v1906_v51, %v1905_v50  ;;  %v3565_v46 = vld [vmem:[%s3897_s10] ss:$0 sm:$0xff] }
 0x304   :  { %v1689_v56 = vadd.f32 %v2816_v52, %v3496_v10  ;;  %v1680_v57 = vpop.f32.mrb[117].mxu0  ;;  %v1943_v58 = vpack.c.bf16 %v1904_v54, %v1903_v53 }
 0x305   :  { %v1681_v59 = vadd.f32 %v3496_v10, %v1680_v57  ;;  %v2817_v60 = vpop.f32.mrb[118].mxu0 }
 0x306   :  { %v1845_v61 = vmul.f32 0.01, %v1689_v56  ;;  %v1692_v62 = vadd.f32 %v2817_v60, %v3496_v10  ;;  %v1683_v63 = vpop.f32.mrb[119].mxu0  ;;  %2890 = vmatprep.mubr.bf16.mxu1 %v1943_v58  ;;  %vm1781_vm5 = vcmp.ge.f32.partialorder %v1689_v56, 0.0 }
 0x307   :  { %v1843_v0 = vmul.f32 0.01, %v1681_v59  ;;  %v1684_v1 = vadd.f32 %v3496_v10, %v1683_v63  ;;  %2891 = vmatmul.mubr.bf16.gmra.mrb[108].mxu1 %v1944_v55  ;;  %vm1779_vm6 = vcmp.ge.f32.partialorder %v1681_v59, 0.0 }
 0x308   :  { %vm1782_vm7 = vcmp.ge.f32.partialorder %v1692_v62, 0.0  ;;  %v1846_v2 = vmul.f32 0.01, %v1692_v62  ;;  %v1909_v4 = vsel %vm1781_vm5, %v1689_v56, %v1845_v61 }
 0x309   :  { %vm1780_vm8 = vcmp.ge.f32.partialorder %v1684_v1, 0.0  ;;  %v1844_v3 = vmul.f32 0.01, %v1684_v1  ;;  %v1907_v7 = vsel %vm1779_vm6, %v1681_v59, %v1843_v0 }
 0x30a   :  { %v1910_v5 = vsel %vm1782_vm7, %v1692_v62, %v1846_v2 }
 0x30b   :  { %v2820_v6 = vpop.f32.mrb[120].mxu0  ;;  %v1908_v8 = vsel %vm1780_vm8, %v1684_v1, %v1844_v3  ;;  %v1946_v9 = vpack.c.bf16 %v1910_v5, %v1909_v4 }
 0x30c   :  { %v1705_v49 = vadd.f32 %v2820_v6, %v3496_v10  ;;  %v1696_v11 = vpop.f32.mrb[121].mxu0  ;;  %v1945_v12 = vpack.c.bf16 %v1908_v8, %v1907_v7 }
 0x30d   :  { %v1697_v13 = vadd.f32 %v3496_v10, %v1696_v11  ;;  %v2821_v14 = vpop.f32.mrb[122].mxu0 }
 0x30e   :  { %v1849_v15 = vmul.f32 0.01, %v1705_v49  ;;  %v1708_v16 = vadd.f32 %v2821_v14, %v3496_v10  ;;  %v1699_v17 = vpop.f32.mrb[123].mxu0  ;;  %2894 = vmatprep.mubr.bf16.mxu1 %v1945_v12  ;;  %vm1785_vm9 = vcmp.ge.f32.partialorder %v1705_v49, 0.0 }
 0x30f   :  { %v1847_v18 = vmul.f32 0.01, %v1697_v13  ;;  %v1700_v19 = vadd.f32 %v3496_v10, %v1699_v17  ;;  %2895 = vmatmul.mubr.bf16.gmra.mrb[112].mxu1 %v1946_v9  ;;  %vm1783_vm10 = vcmp.ge.f32.partialorder %v1697_v13, 0.0 }
 0x310   :  { %vm1786_vm11 = vcmp.ge.f32.partialorder %v1708_v16, 0.0  ;;  %v1850_v20 = vmul.f32 0.01, %v1708_v16  ;;  %v1913_v22 = vsel %vm1785_vm9, %v1705_v49, %v1849_v15 }
 0x311   :  { %vm1784_vm12 = vcmp.ge.f32.partialorder %v1700_v19, 0.0  ;;  %v1848_v21 = vmul.f32 0.01, %v1700_v19  ;;  %v1911_v25 = vsel %vm1783_vm10, %v1697_v13, %v1847_v18 }
 0x312   :  { %v1914_v23 = vsel %vm1786_vm11, %v1708_v16, %v1850_v20 }
 0x313   :  { %v2824_v24 = vpop.f32.mrb[124].mxu0  ;;  %v1912_v26 = vsel %vm1784_vm12, %v1700_v19, %v1848_v21  ;;  %v1948_v27 = vpack.c.bf16 %v1914_v23, %v1913_v22 }
 0x314   :  { %v1721_v28 = vadd.f32 %v2824_v24, %v3496_v10  ;;  %v1712_v29 = vpop.f32.mrb[125].mxu0  ;;  %v1947_v30 = vpack.c.bf16 %v1912_v26, %v1911_v25 }
 0x315   :  { %v1713_v31 = vadd.f32 %v3496_v10, %v1712_v29  ;;  %v2825_v32 = vpop.f32.mrb[126].mxu0 }
 0x316   :  { %v1853_v33 = vmul.f32 0.01, %v1721_v28  ;;  %v1724_v34 = vadd.f32 %v2825_v32, %v3496_v10  ;;  %v1715_v35 = vpop.f32.mrb[127].mxu0  ;;  %2898 = vmatprep.mubr.bf16.mxu1 %v1947_v30  ;;  %vm1789_vm13 = vcmp.ge.f32.partialorder %v1721_v28, 0.0 }
 0x317   :  { %v1851_v36 = vmul.f32 0.01, %v1713_v31  ;;  %v1716_v37 = vadd.f32 %v3496_v10, %v1715_v35  ;;  %2899 = vmatmul.mubr.bf16.gmra.mrb[116].mxu1 %v1948_v27  ;;  %vm1787_vm14 = vcmp.ge.f32.partialorder %v1713_v31, 0.0 }
 0x318   :  { %vm1790_vm15 = vcmp.ge.f32.partialorder %v1724_v34, 0.0  ;;  %v1854_v38 = vmul.f32 0.01, %v1724_v34  ;;  %v1917_v40 = vsel %vm1789_vm13, %v1721_v28, %v1853_v33 }
 0x319   :  { %vm1788_vm0 = vcmp.ge.f32.partialorder %v1716_v37, 0.0  ;;  %v1852_v39 = vmul.f32 0.01, %v1716_v37  ;;  %v1915_v42 = vsel %vm1787_vm14, %v1713_v31, %v1851_v36 }
 0x31a   :  { %v1918_v41 = vsel %vm1790_vm15, %v1724_v34, %v1854_v38 }
 0x31b   :  { %v1916_v43 = vsel %vm1788_vm0, %v1716_v37, %v1852_v39  ;;  %v1950_v44 = vpack.c.bf16 %v1918_v41, %v1917_v40 }
 0x31c   :  { %v1949_v45 = vpack.c.bf16 %v1916_v43, %v1915_v42 }
 0x31e   :  { %2902 = vmatprep.mubr.bf16.mxu1 %v1949_v45 }
 0x31f   :  { %2903 = vmatmul.mubr.bf16.gmra.mrb[120].mxu1 %v1950_v44 }
 0x37a   :  { %v2844_v10 = vpop.f32.mrb[128].mxu0 }
 0x37b   :  { %v2065_v47 = vadd.f32 %v2844_v10, %v3565_v46  ;;  %v2056_v48 = vpop.f32.mrb[129].mxu0 }
 0x37c   :  { %v2057_v50 = vadd.f32 %v3565_v46, %v2056_v48  ;;  %v2845_v51 = vpop.f32.mrb[130].mxu0 }
 0x37d   :  { %2314 = vst.msk [vmem:[%s3898_s11 + $0x10] sm:$0xff] %vm2311_vm1, %v2065_v47  ;;  %v2068_v52 = vadd.f32 %v2845_v51, %v3565_v46  ;;  %v2059_v53 = vpop.f32.mrb[131].mxu0 }
 0x37e   :  { %2312 = vst.msk [vmem:[%s3898_s11] sm:$0xff] %vm2311_vm1, %v2057_v50  ;;  %v2060_v54 = vadd.f32 %v3565_v46, %v2059_v53 }
 0x37f   :  { %2315 = vst.msk [vmem:[%s3898_s11 + $0x18] sm:$0xff] %vm2311_vm1, %v2068_v52 }
 0x380   :  { %2313 = vst.msk [vmem:[%s3898_s11 + $0x8] sm:$0xff] %vm2311_vm1, %v2060_v54 }
 0x382   :  { %v2848_v55 = vpop.f32.mrb[64].mxu1 }
 0x383   :  { %v2081_v56 = vadd.f32 %v2848_v55, %v3565_v46  ;;  %v2072_v57 = vpop.f32.mrb[65].mxu1 }
 0x384   :  { %v2073_v58 = vadd.f32 %v3565_v46, %v2072_v57  ;;  %v2849_v59 = vpop.f32.mrb[66].mxu1 }
 0x385   :  { %2318 = vst.msk [vmem:[%s3898_s11 + $0x30] sm:$0xff] %vm2311_vm1, %v2081_v56  ;;  %v2084_v60 = vadd.f32 %v2849_v59, %v3565_v46  ;;  %v2075_v61 = vpop.f32.mrb[67].mxu1 }
 0x386   :  { %2316 = vst.msk [vmem:[%s3898_s11 + $0x20] sm:$0xff] %vm2311_vm1, %v2073_v58  ;;  %v2076_v62 = vadd.f32 %v3565_v46, %v2075_v61 }
 0x387   :  { %2319 = vst.msk [vmem:[%s3898_s11 + $0x38] sm:$0xff] %vm2311_vm1, %v2084_v60 }
 0x388   :  { %2317 = vst.msk [vmem:[%s3898_s11 + $0x28] sm:$0xff] %vm2311_vm1, %v2076_v62 }
 0x38a   :  { %v2852_v63 = vpop.f32.mrb[68].mxu1 }
 0x38b   :  { %v2097_v0 = vadd.f32 %v2852_v63, %v3565_v46  ;;  %v2088_v1 = vpop.f32.mrb[69].mxu1 }
 0x38c   :  { %v2089_v2 = vadd.f32 %v3565_v46, %v2088_v1  ;;  %v2853_v3 = vpop.f32.mrb[70].mxu1 }
 0x38d   :  { %2322 = vst.msk [vmem:[%s3898_s11 + $0x50] sm:$0xff] %vm2311_vm1, %v2097_v0  ;;  %v2100_v4 = vadd.f32 %v2853_v3, %v3565_v46  ;;  %v2091_v5 = vpop.f32.mrb[71].mxu1 }
 0x38e   :  { %2320 = vst.msk [vmem:[%s3898_s11 + $0x40] sm:$0xff] %vm2311_vm1, %v2089_v2  ;;  %v2092_v6 = vadd.f32 %v3565_v46, %v2091_v5 }
 0x38f   :  { %2323 = vst.msk [vmem:[%s3898_s11 + $0x58] sm:$0xff] %vm2311_vm1, %v2100_v4 }
 0x390   :  { %2321 = vst.msk [vmem:[%s3898_s11 + $0x48] sm:$0xff] %vm2311_vm1, %v2092_v6 }
 0x392   :  { %v2856_v7 = vpop.f32.mrb[72].mxu1 }
 0x393   :  { %v2113_v8 = vadd.f32 %v2856_v7, %v3565_v46  ;;  %v2104_v9 = vpop.f32.mrb[73].mxu1 }
 0x394   :  { %v2105_v49 = vadd.f32 %v3565_v46, %v2104_v9  ;;  %v2857_v11 = vpop.f32.mrb[74].mxu1 }
 0x395   :  { %2326 = vst.msk [vmem:[%s3898_s11 + $0x70] sm:$0xff] %vm2311_vm1, %v2113_v8  ;;  %v2116_v12 = vadd.f32 %v2857_v11, %v3565_v46  ;;  %v2107_v13 = vpop.f32.mrb[75].mxu1 }
 0x396   :  { %2324 = vst.msk [vmem:[%s3898_s11 + $0x60] sm:$0xff] %vm2311_vm1, %v2105_v49  ;;  %v2108_v14 = vadd.f32 %v3565_v46, %v2107_v13 }
 0x397   :  { %2327 = vst.msk [vmem:[%s3898_s11 + $0x78] sm:$0xff] %vm2311_vm1, %v2116_v12 }
 0x398   :  { %2325 = vst.msk [vmem:[%s3898_s11 + $0x68] sm:$0xff] %vm2311_vm1, %v2108_v14 }
 0x39a   :  { %v2860_v15 = vpop.f32.mrb[76].mxu1 }
 0x39b   :  { %v2129_v16 = vadd.f32 %v2860_v15, %v3565_v46  ;;  %v2120_v17 = vpop.f32.mrb[77].mxu1 }
 0x39c   :  { %v2121_v18 = vadd.f32 %v3565_v46, %v2120_v17  ;;  %v2861_v19 = vpop.f32.mrb[78].mxu1 }
 0x39d   :  { %2330 = vst.msk [vmem:[%s3898_s11 + $0x90] sm:$0xff] %vm2311_vm1, %v2129_v16  ;;  %v2132_v20 = vadd.f32 %v2861_v19, %v3565_v46  ;;  %v2123_v21 = vpop.f32.mrb[79].mxu1 }
 0x39e   :  { %2328 = vst.msk [vmem:[%s3898_s11 + $0x80] sm:$0xff] %vm2311_vm1, %v2121_v18  ;;  %v2124_v22 = vadd.f32 %v3565_v46, %v2123_v21 }
 0x39f   :  { %2331 = vst.msk [vmem:[%s3898_s11 + $0x98] sm:$0xff] %vm2311_vm1, %v2132_v20 }
 0x3a0   :  { %2329 = vst.msk [vmem:[%s3898_s11 + $0x88] sm:$0xff] %vm2311_vm1, %v2124_v22 }
 0x3a2   :  { %v2864_v23 = vpop.f32.mrb[80].mxu1 }
 0x3a3   :  { %v2145_v24 = vadd.f32 %v2864_v23, %v3565_v46  ;;  %v2136_v25 = vpop.f32.mrb[81].mxu1 }
 0x3a4   :  { %v2137_v26 = vadd.f32 %v3565_v46, %v2136_v25  ;;  %v2865_v27 = vpop.f32.mrb[82].mxu1 }
 0x3a5   :  { %2334 = vst.msk [vmem:[%s3898_s11 + $0xb0] sm:$0xff] %vm2311_vm1, %v2145_v24  ;;  %v2148_v28 = vadd.f32 %v2865_v27, %v3565_v46  ;;  %v2139_v29 = vpop.f32.mrb[83].mxu1 }
 0x3a6   :  { %2332 = vst.msk [vmem:[%s3898_s11 + $0xa0] sm:$0xff] %vm2311_vm1, %v2137_v26  ;;  %v2140_v30 = vadd.f32 %v3565_v46, %v2139_v29 }
 0x3a7   :  { %2335 = vst.msk [vmem:[%s3898_s11 + $0xb8] sm:$0xff] %vm2311_vm1, %v2148_v28 }
 0x3a8   :  { %2333 = vst.msk [vmem:[%s3898_s11 + $0xa8] sm:$0xff] %vm2311_vm1, %v2140_v30 }
 0x3aa   :  { %v2868_v31 = vpop.f32.mrb[84].mxu1 }
 0x3ab   :  { %v2161_v32 = vadd.f32 %v2868_v31, %v3565_v46  ;;  %v2152_v33 = vpop.f32.mrb[85].mxu1 }
 0x3ac   :  { %v2153_v34 = vadd.f32 %v3565_v46, %v2152_v33  ;;  %v2869_v35 = vpop.f32.mrb[86].mxu1 }
 0x3ad   :  { %2338 = vst.msk [vmem:[%s3898_s11 + $0xd0] sm:$0xff] %vm2311_vm1, %v2161_v32  ;;  %v2164_v36 = vadd.f32 %v2869_v35, %v3565_v46  ;;  %v2155_v37 = vpop.f32.mrb[87].mxu1 }
 0x3ae   :  { %2336 = vst.msk [vmem:[%s3898_s11 + $0xc0] sm:$0xff] %vm2311_vm1, %v2153_v34  ;;  %v2156_v38 = vadd.f32 %v3565_v46, %v2155_v37 }
 0x3af   :  { %2339 = vst.msk [vmem:[%s3898_s11 + $0xd8] sm:$0xff] %vm2311_vm1, %v2164_v36 }
 0x3b0   :  { %2337 = vst.msk [vmem:[%s3898_s11 + $0xc8] sm:$0xff] %vm2311_vm1, %v2156_v38 }
 0x3b2   :  { %v2872_v39 = vpop.f32.mrb[88].mxu1 }
 0x3b3   :  { %v2177_v40 = vadd.f32 %v2872_v39, %v3565_v46  ;;  %v2168_v41 = vpop.f32.mrb[89].mxu1 }
 0x3b4   :  { %v2169_v42 = vadd.f32 %v3565_v46, %v2168_v41  ;;  %v2873_v43 = vpop.f32.mrb[90].mxu1 }
 0x3b5   :  { %2342 = vst.msk [vmem:[%s3898_s11 + $0xf0] sm:$0xff] %vm2311_vm1, %v2177_v40  ;;  %v2180_v44 = vadd.f32 %v2873_v43, %v3565_v46  ;;  %v2171_v45 = vpop.f32.mrb[91].mxu1 }
 0x3b6   :  { %2340 = vst.msk [vmem:[%s3898_s11 + $0xe0] sm:$0xff] %vm2311_vm1, %v2169_v42  ;;  %v2172_v10 = vadd.f32 %v3565_v46, %v2171_v45 }
 0x3b7   :  { %2343 = vst.msk [vmem:[%s3898_s11 + $0xf8] sm:$0xff] %vm2311_vm1, %v2180_v44 }
 0x3b8   :  { %2341 = vst.msk [vmem:[%s3898_s11 + $0xe8] sm:$0xff] %vm2311_vm1, %v2172_v10 }
 0x3ba   :  { %v2876_v47 = vpop.f32.mrb[92].mxu1 }
 0x3bb   :  { %v2193_v48 = vadd.f32 %v2876_v47, %v3565_v46  ;;  %v2184_v50 = vpop.f32.mrb[93].mxu1 }
 0x3bc   :  { %v2185_v51 = vadd.f32 %v3565_v46, %v2184_v50  ;;  %v2877_v52 = vpop.f32.mrb[94].mxu1 }
 0x3bd   :  { %2346 = vst.msk [vmem:[%s3898_s11 + $0x110] sm:$0xff] %vm2311_vm1, %v2193_v48  ;;  %v2196_v53 = vadd.f32 %v2877_v52, %v3565_v46  ;;  %v2187_v54 = vpop.f32.mrb[95].mxu1 }
 0x3be   :  { %2344 = vst.msk [vmem:[%s3898_s11 + $0x100] sm:$0xff] %vm2311_vm1, %v2185_v51  ;;  %v2188_v55 = vadd.f32 %v3565_v46, %v2187_v54 }
 0x3bf   :  { %2347 = vst.msk [vmem:[%s3898_s11 + $0x118] sm:$0xff] %vm2311_vm1, %v2196_v53 }
 0x3c0   :  { %2345 = vst.msk [vmem:[%s3898_s11 + $0x108] sm:$0xff] %vm2311_vm1, %v2188_v55 }
 0x3c2   :  { %v2880_v56 = vpop.f32.mrb[96].mxu1 }
 0x3c3   :  { %v2209_v57 = vadd.f32 %v2880_v56, %v3565_v46  ;;  %v2200_v58 = vpop.f32.mrb[97].mxu1 }
 0x3c4   :  { %v2201_v59 = vadd.f32 %v3565_v46, %v2200_v58  ;;  %v2881_v60 = vpop.f32.mrb[98].mxu1 }
 0x3c5   :  { %2350 = vst.msk [vmem:[%s3898_s11 + $0x130] sm:$0xff] %vm2311_vm1, %v2209_v57  ;;  %v2212_v61 = vadd.f32 %v2881_v60, %v3565_v46  ;;  %v2203_v62 = vpop.f32.mrb[99].mxu1 }
 0x3c6   :  { %2348 = vst.msk [vmem:[%s3898_s11 + $0x120] sm:$0xff] %vm2311_vm1, %v2201_v59  ;;  %v2204_v63 = vadd.f32 %v3565_v46, %v2203_v62 }
 0x3c7   :  { %2351 = vst.msk [vmem:[%s3898_s11 + $0x138] sm:$0xff] %vm2311_vm1, %v2212_v61 }
 0x3c8   :  { %2349 = vst.msk [vmem:[%s3898_s11 + $0x128] sm:$0xff] %vm2311_vm1, %v2204_v63 }
 0x3ca   :  { %v2884_v0 = vpop.f32.mrb[100].mxu1 }
 0x3cb   :  { %v2225_v1 = vadd.f32 %v2884_v0, %v3565_v46  ;;  %v2216_v2 = vpop.f32.mrb[101].mxu1 }
 0x3cc   :  { %v2217_v3 = vadd.f32 %v3565_v46, %v2216_v2  ;;  %v2885_v4 = vpop.f32.mrb[102].mxu1 }
 0x3cd   :  { %2354 = vst.msk [vmem:[%s3898_s11 + $0x150] sm:$0xff] %vm2311_vm1, %v2225_v1  ;;  %v2228_v5 = vadd.f32 %v2885_v4, %v3565_v46  ;;  %v2219_v6 = vpop.f32.mrb[103].mxu1 }
 0x3ce   :  { %2352 = vst.msk [vmem:[%s3898_s11 + $0x140] sm:$0xff] %vm2311_vm1, %v2217_v3  ;;  %v2220_v7 = vadd.f32 %v3565_v46, %v2219_v6 }
 0x3cf   :  { %2355 = vst.msk [vmem:[%s3898_s11 + $0x158] sm:$0xff] %vm2311_vm1, %v2228_v5 }
 0x3d0   :  { %2353 = vst.msk [vmem:[%s3898_s11 + $0x148] sm:$0xff] %vm2311_vm1, %v2220_v7 }
 0x3d2   :  { %v2888_v8 = vpop.f32.mrb[104].mxu1 }
 0x3d3   :  { %v2241_v9 = vadd.f32 %v2888_v8, %v3565_v46  ;;  %v2232_v49 = vpop.f32.mrb[105].mxu1 }
 0x3d4   :  { %v2233_v11 = vadd.f32 %v3565_v46, %v2232_v49  ;;  %v2889_v12 = vpop.f32.mrb[106].mxu1 }
 0x3d5   :  { %2358 = vst.msk [vmem:[%s3898_s11 + $0x170] sm:$0xff] %vm2311_vm1, %v2241_v9  ;;  %v2244_v13 = vadd.f32 %v2889_v12, %v3565_v46  ;;  %v2235_v14 = vpop.f32.mrb[107].mxu1 }
 0x3d6   :  { %2356 = vst.msk [vmem:[%s3898_s11 + $0x160] sm:$0xff] %vm2311_vm1, %v2233_v11  ;;  %v2236_v15 = vadd.f32 %v3565_v46, %v2235_v14 }
 0x3d7   :  { %2359 = vst.msk [vmem:[%s3898_s11 + $0x178] sm:$0xff] %vm2311_vm1, %v2244_v13 }
 0x3d8   :  { %2357 = vst.msk [vmem:[%s3898_s11 + $0x168] sm:$0xff] %vm2311_vm1, %v2236_v15 }
 0x3da   :  { %v2892_v16 = vpop.f32.mrb[108].mxu1 }
 0x3db   :  { %v2257_v17 = vadd.f32 %v2892_v16, %v3565_v46  ;;  %v2248_v18 = vpop.f32.mrb[109].mxu1 }
 0x3dc   :  { %v2249_v19 = vadd.f32 %v3565_v46, %v2248_v18  ;;  %v2893_v20 = vpop.f32.mrb[110].mxu1 }
 0x3dd   :  { %2362 = vst.msk [vmem:[%s3898_s11 + $0x190] sm:$0xff] %vm2311_vm1, %v2257_v17  ;;  %v2260_v21 = vadd.f32 %v2893_v20, %v3565_v46  ;;  %v2251_v22 = vpop.f32.mrb[111].mxu1 }
 0x3de   :  { %2360 = vst.msk [vmem:[%s3898_s11 + $0x180] sm:$0xff] %vm2311_vm1, %v2249_v19  ;;  %v2252_v23 = vadd.f32 %v3565_v46, %v2251_v22 }
 0x3df   :  { %2363 = vst.msk [vmem:[%s3898_s11 + $0x198] sm:$0xff] %vm2311_vm1, %v2260_v21 }
 0x3e0   :  { %2361 = vst.msk [vmem:[%s3898_s11 + $0x188] sm:$0xff] %vm2311_vm1, %v2252_v23 }
 0x3e2   :  { %v2896_v24 = vpop.f32.mrb[112].mxu1 }
 0x3e3   :  { %v2273_v25 = vadd.f32 %v2896_v24, %v3565_v46  ;;  %v2264_v26 = vpop.f32.mrb[113].mxu1 }
 0x3e4   :  { %v2265_v27 = vadd.f32 %v3565_v46, %v2264_v26  ;;  %v2897_v28 = vpop.f32.mrb[114].mxu1 }
 0x3e5   :  { %2366 = vst.msk [vmem:[%s3898_s11 + $0x1b0] sm:$0xff] %vm2311_vm1, %v2273_v25  ;;  %v2276_v29 = vadd.f32 %v2897_v28, %v3565_v46  ;;  %v2267_v30 = vpop.f32.mrb[115].mxu1 }
 0x3e6   :  { %2364 = vst.msk [vmem:[%s3898_s11 + $0x1a0] sm:$0xff] %vm2311_vm1, %v2265_v27  ;;  %v2268_v31 = vadd.f32 %v3565_v46, %v2267_v30 }
 0x3e7   :  { %2367 = vst.msk [vmem:[%s3898_s11 + $0x1b8] sm:$0xff] %vm2311_vm1, %v2276_v29 }
 0x3e8   :  { %2365 = vst.msk [vmem:[%s3898_s11 + $0x1a8] sm:$0xff] %vm2311_vm1, %v2268_v31 }
 0x3ea   :  { %v2900_v32 = vpop.f32.mrb[116].mxu1 }
 0x3eb   :  { %v2289_v33 = vadd.f32 %v2900_v32, %v3565_v46  ;;  %v2280_v34 = vpop.f32.mrb[117].mxu1 }
 0x3ec   :  { %v2281_v35 = vadd.f32 %v3565_v46, %v2280_v34  ;;  %v2901_v36 = vpop.f32.mrb[118].mxu1 }
 0x3ed   :  { %2370 = vst.msk [vmem:[%s3898_s11 + $0x1d0] sm:$0xff] %vm2311_vm1, %v2289_v33  ;;  %v2292_v37 = vadd.f32 %v2901_v36, %v3565_v46  ;;  %v2283_v38 = vpop.f32.mrb[119].mxu1 }
 0x3ee   :  { %2368 = vst.msk [vmem:[%s3898_s11 + $0x1c0] sm:$0xff] %vm2311_vm1, %v2281_v35  ;;  %v2284_v39 = vadd.f32 %v3565_v46, %v2283_v38 }
 0x3ef   :  { %2371 = vst.msk [vmem:[%s3898_s11 + $0x1d8] sm:$0xff] %vm2311_vm1, %v2292_v37 }
 0x3f0   :  { %2369 = vst.msk [vmem:[%s3898_s11 + $0x1c8] sm:$0xff] %vm2311_vm1, %v2284_v39 }
 0x3f2   :  { %v2904_v40 = vpop.f32.mrb[120].mxu1 }
 0x3f3   :  { %v2305_v41 = vadd.f32 %v2904_v40, %v3565_v46  ;;  %v2296_v42 = vpop.f32.mrb[121].mxu1 }
 0x3f4   :  { %v2297_v43 = vadd.f32 %v3565_v46, %v2296_v42  ;;  %v2905_v44 = vpop.f32.mrb[122].mxu1 }
 0x3f5   :  { %2374 = vst.msk [vmem:[%s3898_s11 + $0x1f0] sm:$0xff] %vm2311_vm1, %v2305_v41  ;;  %v2308_v45 = vadd.f32 %v2905_v44, %v3565_v46  ;;  %v2299_v10 = vpop.f32.mrb[123].mxu1 }
 0x3f6   :  { %2372 = vst.msk [vmem:[%s3898_s11 + $0x1e0] sm:$0xff] %vm2311_vm1, %v2297_v43  ;;  %v2300_v47 = vadd.f32 %v3565_v46, %v2299_v10 }
 0x3f7   :  { %2375 = vst.msk [vmem:[%s3898_s11 + $0x1f8] sm:$0xff] %vm2311_vm1, %v2308_v45 }
 0x3f8   :  { %2373 = vst.msk [vmem:[%s3898_s11 + $0x1e8] sm:$0xff] %vm2311_vm1, %v2300_v47 }

</bundles_post_ra>
